<compile_context>
chip_gen: v7x
topology: tpu7x:2x2x1
jax: 0.10.0
libtpu: 0.0.40
codegen_flags: <defaults>
</compile_context>

<pallas_src>
import functools

import jax
import jax.numpy as jnp
from jax.experimental import pallas as pl
from jax.experimental.pallas import tpu as pltpu

EPS = 1e-5


def _round_up(v, m):
    return ((v + m - 1) // m) * m


def _bn_relu(acc, mask, gamma, beta, inv_m):
    """Training-mode BatchNorm (biased var, two-pass) + folded affine + ReLU.

    acc:   (C, P) f32 conv accumulator; non-interior lanes hold don't-cares.
    mask:  (1, P) f32, 1.0 at valid (interior) spatial positions, 0.0 elsewhere.
    gamma, beta: (C, 1) f32.
    inv_m: 1 / (N*H*W), number of valid positions per channel.
    """
    mean = jnp.sum(acc * mask, axis=1, keepdims=True) * inv_m
    diff = (acc - mean) * mask
    var = jnp.sum(diff * diff, axis=1, keepdims=True) * inv_m   # biased variance
    scale = gamma * jax.lax.rsqrt(var + EPS)                    # fold BN affine
    shift = beta - mean * scale
    return jnp.maximum(acc * scale + shift, 0.0)


def _stage_taps(rhs_ref, src_f32, deltas, c_p, p_pad):
    """im2col into VMEM: for each 3x3 tap, store a lane-shifted bf16 copy.

    Interior output lanes never read wrapped-around lanes (the per-image
    padding ring absorbs every tap offset), so a circular roll is exact there;
    non-interior lanes are masked / cropped downstream.
    """
    for t, d in enumerate(deltas):                              # unrolled at trace time
        shifted = src_f32 if d == 0 else pltpu.roll(src_f32, shift=(-d) % p_pad, axis=1)
        rhs_ref[pl.ds(t * c_p, c_p), :] = shifted.astype(jnp.bfloat16)


def _fused_unet_block_kernel(x_ref, w1_ref, g1_ref, be1_ref,
                             w2_ref, g2_ref, be2_ref, mask_ref,
                             o_ref, rhs1_ref, rhs2_ref,
                             *, deltas, cin_p, cout_p, p_pad, inv_m):
    mask = mask_ref[...]                                        # (1, P)

    # ---------------- layer 1: conv3x3 -> BN -> ReLU ----------------
    _stage_taps(rhs1_ref, x_ref[...], deltas, cin_p, p_pad)
    acc1 = jnp.dot(w1_ref[...], rhs1_ref[...],
                   preferred_element_type=jnp.float32)          # (Cout_p, P) f32
    # Mask zeroes the padding ring so it serves as layer 2's zero padding.
    h1 = _bn_relu(acc1, mask, g1_ref[...], be1_ref[...], inv_m) * mask

    # ---------------- layer 2: conv3x3 -> BN -> ReLU ----------------
    _stage_taps(rhs2_ref, h1, deltas, cout_p, p_pad)
    acc2 = jnp.dot(w2_ref[...], rhs2_ref[...],
                   preferred_element_type=jnp.float32)
    o_ref[...] = _bn_relu(acc2, mask, g2_ref[...], be2_ref[...], inv_m)


def unet_block_forward(x_nchw, params):
    n, cin, h, w = x_nchw.shape
    cout = params["w1"].shape[0]
    hp, wp = h + 2, w + 2
    p_raw = n * hp * wp
    p_pad = _round_up(p_raw, 128)           # lane-dense: multiple of 128
    cin_p = _round_up(cin, 16)              # bf16 sublane tile = 16
    cout_p = _round_up(cout, 16)
    m_valid = n * h * w

    # Channels-major, spatially zero-padded, flattened, lane/sublane-padded input.
    xp = jnp.pad(x_nchw, ((0, 0), (0, 0), (1, 1), (1, 1)))               # (N,Cin,Hp,Wp)
    x_slab = jnp.transpose(xp, (1, 0, 2, 3)).reshape(cin, p_raw)
    x_slab = jnp.pad(x_slab.astype(jnp.float32),
                     ((0, cin_p - cin), (0, p_pad - p_raw)))             # (Cin_p, P)

    # Tap-stacked bf16 weights: W[o, t*Ci_p + i] = w[o, i, kh, kw], t = kh*3+kw.
    def stack_weights(wgt, ci, ci_p):
        co = wgt.shape[0]
        wt = jnp.transpose(wgt, (0, 2, 3, 1)).reshape(co, 9, ci)
        wt = jnp.pad(wt, ((0, cout_p - co), (0, 0), (0, ci_p - ci)))
        return wt.reshape(cout_p, 9 * ci_p).astype(jnp.bfloat16)

    w1s = stack_weights(params["w1"], cin, cin_p)
    w2s = stack_weights(params["w2"], cout, cout_p)

    def col(v):  # (Cout,) -> (Cout_p, 1) f32, zero-padded channels
        return jnp.pad(v.astype(jnp.float32), (0, cout_p - cout)).reshape(cout_p, 1)

    g1, be1 = col(params["g1"]), col(params["be1"])
    g2, be2 = col(params["g2"]), col(params["be2"])
    # NOTE: conv biases b1/b2 are intentionally not passed: a per-channel
    # constant cancels exactly under training-mode BatchNorm.

    # Interior-position (valid output) mask in the padded-flat layout.
    rr = (jnp.arange(hp) >= 1) & (jnp.arange(hp) <= h)
    cc = (jnp.arange(wp) >= 1) & (jnp.arange(wp) <= w)
    m2d = (rr[:, None] & cc[None, :]).astype(jnp.float32).reshape(-1)    # (Hp*Wp,)
    mask = jnp.pad(jnp.tile(m2d, n), (0, p_pad - p_raw)).reshape(1, p_pad)

    # Static lane shift of each 3x3 tap in the flattened padded layout.
    deltas = tuple((kh - 1) * wp + (kw - 1) for kh in range(3) for kw in range(3))

    kernel = functools.partial(
        _fused_unet_block_kernel, deltas=deltas, cin_p=cin_p, cout_p=cout_p,
        p_pad=p_pad, inv_m=1.0 / m_valid)

    out_slab = pl.pallas_call(
        kernel,
        out_shape=jax.ShapeDtypeStruct((cout_p, p_pad), jnp.float32),
        in_specs=[pl.BlockSpec(memory_space=pltpu.MemorySpace.VMEM)] * 8,
        out_specs=pl.BlockSpec(memory_space=pltpu.MemorySpace.VMEM),
        scratch_shapes=[pltpu.VMEM((9 * cin_p, p_pad), jnp.bfloat16),   # im2col layer 1
                        pltpu.VMEM((9 * cout_p, p_pad), jnp.bfloat16)], # im2col layer 2
        compiler_params=pltpu.CompilerParams(vmem_limit_bytes=32 * 1024 * 1024),
    )(x_slab, w1s, g1, be1, w2s, g2, be2, mask)

    # (Cout_p, P) -> crop pad channels/lanes -> (Cout,N,Hp,Wp) -> interior -> NCHW.
    out = out_slab[:cout, :p_raw].reshape(cout, n, hp, wp)[:, :, 1:h + 1, 1:w + 1]
    return jnp.transpose(out, (1, 0, 2, 3))


def reference_forward(x_nchw, params):
    """Pure-JAX f32 reference mirroring the PyTorch module (training-mode BN)."""
    def block(x, wgt, b, g, be):
        y = jax.lax.conv_general_dilated(
            x, wgt, window_strides=(1, 1), padding=((1, 1), (1, 1)),
            dimension_numbers=("NCHW", "OIHW", "NCHW"))
        y = y + b[None, :, None, None]
        mean = jnp.mean(y, axis=(0, 2, 3), keepdims=True)
        var = jnp.mean((y - mean) ** 2, axis=(0, 2, 3), keepdims=True)
        y = (y - mean) * jax.lax.rsqrt(var + EPS)
        y = y * g[None, :, None, None] + be[None, :, None, None]
        return jnp.maximum(y, 0.0)

    y = block(x_nchw, params["w1"], params["b1"], params["g1"], params["be1"])
    y = block(y, params["w2"], params["b2"], params["g2"], params["be2"])
    return y


if __name__ == "__main__":
    in_ch, out_ch = 4, 8
    n, h, w = 2, 16, 16

    key = jax.random.PRNGKey(0)
    ks = jax.random.split(key, 9)
    x = jax.random.normal(ks[0], (n, in_ch, h, w), jnp.float32)
    params = {
        "w1": 0.1 * jax.random.normal(ks[1], (out_ch, in_ch, 3, 3), jnp.float32),
        "b1": 0.1 * jax.random.normal(ks[2], (out_ch,), jnp.float32),
        "g1": 1.0 + 0.1 * jax.random.normal(ks[3], (out_ch,), jnp.float32),
        "be1": 0.1 * jax.random.normal(ks[4], (out_ch,), jnp.float32),
        "w2": 0.1 * jax.random.normal(ks[5], (out_ch, out_ch, 3, 3), jnp.float32),
        "b2": 0.1 * jax.random.normal(ks[6], (out_ch,), jnp.float32),
        "g2": 1.0 + 0.1 * jax.random.normal(ks[7], (out_ch,), jnp.float32),
        "be2": 0.1 * jax.random.normal(ks[8], (out_ch,), jnp.float32),
    }

    out = jax.block_until_ready(unet_block_forward(x, params))
    assert out.shape == (n, out_ch, h, w), out.shape

    ref = reference_forward(x, params)
    max_err = float(jnp.max(jnp.abs(out - ref)))
    # Tolerance dominated by bf16 quantization of conv inputs/weights through
    # two conv+BN layers (f32 accumulation); kernel logic itself is exact.
    assert max_err < 6e-2, f"max abs error {max_err} too large"

    print("KERNEL_OK")
</pallas_src>

<mosaic_0001>
module attributes {stable_mosaic.version = 11 : i64} {
  func.func @_fused_unet_block_kernel(%arg0: memref<16x768xf32, #tpu.memory_space<vmem>>, %arg1: memref<16x144xbf16, #tpu.memory_space<vmem>>, %arg2: memref<16x1xf32, #tpu.memory_space<vmem>>, %arg3: memref<16x1xf32, #tpu.memory_space<vmem>>, %arg4: memref<16x144xbf16, #tpu.memory_space<vmem>>, %arg5: memref<16x1xf32, #tpu.memory_space<vmem>>, %arg6: memref<16x1xf32, #tpu.memory_space<vmem>>, %arg7: memref<1x768xf32, #tpu.memory_space<vmem>>, %arg8: memref<16x768xf32, #tpu.memory_space<vmem>>, %arg9: memref<144x768xbf16, #tpu.memory_space<vmem>>, %arg10: memref<144x768xbf16, #tpu.memory_space<vmem>>) attributes {dimension_semantics = [], scalar_prefetch = 0 : i64, scratch_operands = 2 : i64, tpu.core_type = #tpu.core_type<tc>} {
    %c0 = arith.constant 0 : index
    %c0_0 = arith.constant 0 : index
    %0 = vector.load %arg7[%c0, %c0_0] : memref<1x768xf32, #tpu.memory_space<vmem>>, vector<1x768xf32>
    %c0_1 = arith.constant 0 : index
    %c0_2 = arith.constant 0 : index
    %1 = vector.load %arg0[%c0_1, %c0_2] : memref<16x768xf32, #tpu.memory_space<vmem>>, vector<16x768xf32>
    %c19_i32 = arith.constant 19 : i32
    %2 = tpu.dynamic_rotate %1 by %c19_i32 dim 1 : vector<16x768xf32>, i32 -> vector<16x768xf32>
    %3 = arith.truncf %2 : vector<16x768xf32> to vector<16x768xbf16>
    %c0_3 = arith.constant 0 : index
    %c0_4 = arith.constant 0 : index
    %4 = vector.load %arg9[%c0_3, %c0_4] : memref<144x768xbf16, #tpu.memory_space<vmem>>, vector<16x768xbf16>
    tpu.vector_store %arg9[%c0_3, %c0_4], %3 {strides = array<i32>} : memref<144x768xbf16, #tpu.memory_space<vmem>>, vector<16x768xbf16>,
    %c18_i32 = arith.constant 18 : i32
    %5 = tpu.dynamic_rotate %1 by %c18_i32 dim 1 : vector<16x768xf32>, i32 -> vector<16x768xf32>
    %6 = arith.truncf %5 : vector<16x768xf32> to vector<16x768xbf16>
    %c16 = arith.constant 16 : index
    %c0_5 = arith.constant 0 : index
    %7 = vector.load %arg9[%c16, %c0_5] : memref<144x768xbf16, #tpu.memory_space<vmem>>, vector<16x768xbf16>
    tpu.vector_store %arg9[%c16, %c0_5], %6 {strides = array<i32>} : memref<144x768xbf16, #tpu.memory_space<vmem>>, vector<16x768xbf16>,
    %c17_i32 = arith.constant 17 : i32
    %8 = tpu.dynamic_rotate %1 by %c17_i32 dim 1 : vector<16x768xf32>, i32 -> vector<16x768xf32>
    %9 = arith.truncf %8 : vector<16x768xf32> to vector<16x768xbf16>
    %c32 = arith.constant 32 : index
    %c0_6 = arith.constant 0 : index
    %10 = vector.load %arg9[%c32, %c0_6] : memref<144x768xbf16, #tpu.memory_space<vmem>>, vector<16x768xbf16>
    tpu.vector_store %arg9[%c32, %c0_6], %9 {strides = array<i32>} : memref<144x768xbf16, #tpu.memory_space<vmem>>, vector<16x768xbf16>,
    %c1_i32 = arith.constant 1 : i32
    %11 = tpu.dynamic_rotate %1 by %c1_i32 dim 1 : vector<16x768xf32>, i32 -> vector<16x768xf32>
    %12 = arith.truncf %11 : vector<16x768xf32> to vector<16x768xbf16>
    %c48 = arith.constant 48 : index
    %c0_7 = arith.constant 0 : index
    %13 = vector.load %arg9[%c48, %c0_7] : memref<144x768xbf16, #tpu.memory_space<vmem>>, vector<16x768xbf16>
    tpu.vector_store %arg9[%c48, %c0_7], %12 {strides = array<i32>} : memref<144x768xbf16, #tpu.memory_space<vmem>>, vector<16x768xbf16>,
    %14 = arith.truncf %1 : vector<16x768xf32> to vector<16x768xbf16>
    %c64 = arith.constant 64 : index
    %c0_8 = arith.constant 0 : index
    %15 = vector.load %arg9[%c64, %c0_8] : memref<144x768xbf16, #tpu.memory_space<vmem>>, vector<16x768xbf16>
    tpu.vector_store %arg9[%c64, %c0_8], %14 {strides = array<i32>} : memref<144x768xbf16, #tpu.memory_space<vmem>>, vector<16x768xbf16>,
    %c767_i32 = arith.constant 767 : i32
    %16 = tpu.dynamic_rotate %1 by %c767_i32 dim 1 : vector<16x768xf32>, i32 -> vector<16x768xf32>
    %17 = arith.truncf %16 : vector<16x768xf32> to vector<16x768xbf16>
    %c80 = arith.constant 80 : index
    %c0_9 = arith.constant 0 : index
    %18 = vector.load %arg9[%c80, %c0_9] : memref<144x768xbf16, #tpu.memory_space<vmem>>, vector<16x768xbf16>
    tpu.vector_store %arg9[%c80, %c0_9], %17 {strides = array<i32>} : memref<144x768xbf16, #tpu.memory_space<vmem>>, vector<16x768xbf16>,
    %c751_i32 = arith.constant 751 : i32
    %19 = tpu.dynamic_rotate %1 by %c751_i32 dim 1 : vector<16x768xf32>, i32 -> vector<16x768xf32>
    %20 = arith.truncf %19 : vector<16x768xf32> to vector<16x768xbf16>
    %c96 = arith.constant 96 : index
    %c0_10 = arith.constant 0 : index
    %21 = vector.load %arg9[%c96, %c0_10] : memref<144x768xbf16, #tpu.memory_space<vmem>>, vector<16x768xbf16>
    tpu.vector_store %arg9[%c96, %c0_10], %20 {strides = array<i32>} : memref<144x768xbf16, #tpu.memory_space<vmem>>, vector<16x768xbf16>,
    %c750_i32 = arith.constant 750 : i32
    %22 = tpu.dynamic_rotate %1 by %c750_i32 dim 1 : vector<16x768xf32>, i32 -> vector<16x768xf32>
    %23 = arith.truncf %22 : vector<16x768xf32> to vector<16x768xbf16>
    %c112 = arith.constant 112 : index
    %c0_11 = arith.constant 0 : index
    %24 = vector.load %arg9[%c112, %c0_11] : memref<144x768xbf16, #tpu.memory_space<vmem>>, vector<16x768xbf16>
    tpu.vector_store %arg9[%c112, %c0_11], %23 {strides = array<i32>} : memref<144x768xbf16, #tpu.memory_space<vmem>>, vector<16x768xbf16>,
    %c749_i32 = arith.constant 749 : i32
    %25 = tpu.dynamic_rotate %1 by %c749_i32 dim 1 : vector<16x768xf32>, i32 -> vector<16x768xf32>
    %26 = arith.truncf %25 : vector<16x768xf32> to vector<16x768xbf16>
    %c128 = arith.constant 128 : index
    %c0_12 = arith.constant 0 : index
    %27 = vector.load %arg9[%c128, %c0_12] : memref<144x768xbf16, #tpu.memory_space<vmem>>, vector<16x768xbf16>
    tpu.vector_store %arg9[%c128, %c0_12], %26 {strides = array<i32>} : memref<144x768xbf16, #tpu.memory_space<vmem>>, vector<16x768xbf16>,
    %c0_13 = arith.constant 0 : index
    %c0_14 = arith.constant 0 : index
    %28 = vector.load %arg1[%c0_13, %c0_14] : memref<16x144xbf16, #tpu.memory_space<vmem>>, vector<16x144xbf16>
    %c0_15 = arith.constant 0 : index
    %c0_16 = arith.constant 0 : index
    %29 = vector.load %arg9[%c0_15, %c0_16] : memref<144x768xbf16, #tpu.memory_space<vmem>>, vector<144x768xbf16>
    %cst = arith.constant dense<0.000000e+00> : vector<16x768xf32>
    %30 = tpu.matmul %28, %29, %cst {dimension_numbers = #tpu.dot_dimension_numbers<[1], [0], [0], [1], [0, 0, 1, 1], [], []>} : vector<16x144xbf16>, vector<144x768xbf16>, vector<16x768xf32> -> vector<16x768xf32>
    %c0_17 = arith.constant 0 : index
    %c0_18 = arith.constant 0 : index
    %31 = vector.load %arg2[%c0_17, %c0_18] : memref<16x1xf32, #tpu.memory_space<vmem>>, vector<16x1xf32>
    %c0_19 = arith.constant 0 : index
    %c0_20 = arith.constant 0 : index
    %32 = vector.load %arg3[%c0_19, %c0_20] : memref<16x1xf32, #tpu.memory_space<vmem>>, vector<16x1xf32>
    %33 = vector.broadcast %0 : vector<1x768xf32> to vector<16x768xf32>
    %34 = arith.mulf %30, %33 : vector<16x768xf32>
    %cst_21 = arith.constant dense<0.000000e+00> : vector<16xf32>
    %35 = vector.multi_reduction <add>, %34, %cst_21 [1] : vector<16x768xf32> to vector<16xf32>
    %36 = vector.shape_cast %35 : vector<16xf32> to vector<16x1xf32>
    %cst_22 = arith.constant 0.001953125 : f32
    %37 = vector.broadcast %cst_22 : f32 to vector<16x1xf32>
    %38 = arith.mulf %36, %37 : vector<16x1xf32>
    %39 = vector.broadcast %38 : vector<16x1xf32> to vector<16x768xf32>
    %40 = arith.subf %30, %39 : vector<16x768xf32>
    %41 = vector.broadcast %0 : vector<1x768xf32> to vector<16x768xf32>
    %42 = arith.mulf %40, %41 : vector<16x768xf32>
    %43 = arith.mulf %42, %42 : vector<16x768xf32>
    %cst_23 = arith.constant dense<0.000000e+00> : vector<16xf32>
    %44 = vector.multi_reduction <add>, %43, %cst_23 [1] : vector<16x768xf32> to vector<16xf32>
    %45 = vector.shape_cast %44 : vector<16xf32> to vector<16x1xf32>
    %cst_24 = arith.constant 0.001953125 : f32
    %46 = vector.broadcast %cst_24 : f32 to vector<16x1xf32>
    %47 = arith.mulf %45, %46 : vector<16x1xf32>
    %cst_25 = arith.constant 9.99999974E-6 : f32
    %48 = vector.broadcast %cst_25 : f32 to vector<16x1xf32>
    %49 = arith.addf %47, %48 : vector<16x1xf32>
    %50 = math.rsqrt %49 : vector<16x1xf32>
    %51 = arith.mulf %31, %50 : vector<16x1xf32>
    %52 = arith.mulf %38, %51 : vector<16x1xf32>
    %53 = arith.subf %32, %52 : vector<16x1xf32>
    %54 = vector.broadcast %51 : vector<16x1xf32> to vector<16x768xf32>
    %55 = arith.mulf %30, %54 : vector<16x768xf32>
    %56 = vector.broadcast %53 : vector<16x1xf32> to vector<16x768xf32>
    %57 = arith.addf %55, %56 : vector<16x768xf32>
    %cst_26 = arith.constant 0.000000e+00 : f32
    %58 = vector.broadcast %cst_26 : f32 to vector<16x768xf32>
    %59 = arith.maximumf %57, %58 : vector<16x768xf32>
    %60 = vector.broadcast %0 : vector<1x768xf32> to vector<16x768xf32>
    %61 = arith.mulf %59, %60 : vector<16x768xf32>
    %c19_i32_27 = arith.constant 19 : i32
    %62 = tpu.dynamic_rotate %61 by %c19_i32_27 dim 1 : vector<16x768xf32>, i32 -> vector<16x768xf32>
    %63 = arith.truncf %62 : vector<16x768xf32> to vector<16x768xbf16>
    %c0_28 = arith.constant 0 : index
    %c0_29 = arith.constant 0 : index
    %64 = vector.load %arg10[%c0_28, %c0_29] : memref<144x768xbf16, #tpu.memory_space<vmem>>, vector<16x768xbf16>
    tpu.vector_store %arg10[%c0_28, %c0_29], %63 {strides = array<i32>} : memref<144x768xbf16, #tpu.memory_space<vmem>>, vector<16x768xbf16>,
    %c18_i32_30 = arith.constant 18 : i32
    %65 = tpu.dynamic_rotate %61 by %c18_i32_30 dim 1 : vector<16x768xf32>, i32 -> vector<16x768xf32>
    %66 = arith.truncf %65 : vector<16x768xf32> to vector<16x768xbf16>
    %c16_31 = arith.constant 16 : index
    %c0_32 = arith.constant 0 : index
    %67 = vector.load %arg10[%c16_31, %c0_32] : memref<144x768xbf16, #tpu.memory_space<vmem>>, vector<16x768xbf16>
    tpu.vector_store %arg10[%c16_31, %c0_32], %66 {strides = array<i32>} : memref<144x768xbf16, #tpu.memory_space<vmem>>, vector<16x768xbf16>,
    %c17_i32_33 = arith.constant 17 : i32
    %68 = tpu.dynamic_rotate %61 by %c17_i32_33 dim 1 : vector<16x768xf32>, i32 -> vector<16x768xf32>
    %69 = arith.truncf %68 : vector<16x768xf32> to vector<16x768xbf16>
    %c32_34 = arith.constant 32 : index
    %c0_35 = arith.constant 0 : index
    %70 = vector.load %arg10[%c32_34, %c0_35] : memref<144x768xbf16, #tpu.memory_space<vmem>>, vector<16x768xbf16>
    tpu.vector_store %arg10[%c32_34, %c0_35], %69 {strides = array<i32>} : memref<144x768xbf16, #tpu.memory_space<vmem>>, vector<16x768xbf16>,
    %c1_i32_36 = arith.constant 1 : i32
    %71 = tpu.dynamic_rotate %61 by %c1_i32_36 dim 1 : vector<16x768xf32>, i32 -> vector<16x768xf32>
    %72 = arith.truncf %71 : vector<16x768xf32> to vector<16x768xbf16>
    %c48_37 = arith.constant 48 : index
    %c0_38 = arith.constant 0 : index
    %73 = vector.load %arg10[%c48_37, %c0_38] : memref<144x768xbf16, #tpu.memory_space<vmem>>, vector<16x768xbf16>
    tpu.vector_store %arg10[%c48_37, %c0_38], %72 {strides = array<i32>} : memref<144x768xbf16, #tpu.memory_space<vmem>>, vector<16x768xbf16>,
    %74 = arith.truncf %61 : vector<16x768xf32> to vector<16x768xbf16>
    %c64_39 = arith.constant 64 : index
    %c0_40 = arith.constant 0 : index
    %75 = vector.load %arg10[%c64_39, %c0_40] : memref<144x768xbf16, #tpu.memory_space<vmem>>, vector<16x768xbf16>
    tpu.vector_store %arg10[%c64_39, %c0_40], %74 {strides = array<i32>} : memref<144x768xbf16, #tpu.memory_space<vmem>>, vector<16x768xbf16>,
    %c767_i32_41 = arith.constant 767 : i32
    %76 = tpu.dynamic_rotate %61 by %c767_i32_41 dim 1 : vector<16x768xf32>, i32 -> vector<16x768xf32>
    %77 = arith.truncf %76 : vector<16x768xf32> to vector<16x768xbf16>
    %c80_42 = arith.constant 80 : index
    %c0_43 = arith.constant 0 : index
    %78 = vector.load %arg10[%c80_42, %c0_43] : memref<144x768xbf16, #tpu.memory_space<vmem>>, vector<16x768xbf16>
    tpu.vector_store %arg10[%c80_42, %c0_43], %77 {strides = array<i32>} : memref<144x768xbf16, #tpu.memory_space<vmem>>, vector<16x768xbf16>,
    %c751_i32_44 = arith.constant 751 : i32
    %79 = tpu.dynamic_rotate %61 by %c751_i32_44 dim 1 : vector<16x768xf32>, i32 -> vector<16x768xf32>
    %80 = arith.truncf %79 : vector<16x768xf32> to vector<16x768xbf16>
    %c96_45 = arith.constant 96 : index
    %c0_46 = arith.constant 0 : index
    %81 = vector.load %arg10[%c96_45, %c0_46] : memref<144x768xbf16, #tpu.memory_space<vmem>>, vector<16x768xbf16>
    tpu.vector_store %arg10[%c96_45, %c0_46], %80 {strides = array<i32>} : memref<144x768xbf16, #tpu.memory_space<vmem>>, vector<16x768xbf16>,
    %c750_i32_47 = arith.constant 750 : i32
    %82 = tpu.dynamic_rotate %61 by %c750_i32_47 dim 1 : vector<16x768xf32>, i32 -> vector<16x768xf32>
    %83 = arith.truncf %82 : vector<16x768xf32> to vector<16x768xbf16>
    %c112_48 = arith.constant 112 : index
    %c0_49 = arith.constant 0 : index
    %84 = vector.load %arg10[%c112_48, %c0_49] : memref<144x768xbf16, #tpu.memory_space<vmem>>, vector<16x768xbf16>
    tpu.vector_store %arg10[%c112_48, %c0_49], %83 {strides = array<i32>} : memref<144x768xbf16, #tpu.memory_space<vmem>>, vector<16x768xbf16>,
    %c749_i32_50 = arith.constant 749 : i32
    %85 = tpu.dynamic_rotate %61 by %c749_i32_50 dim 1 : vector<16x768xf32>, i32 -> vector<16x768xf32>
    %86 = arith.truncf %85 : vector<16x768xf32> to vector<16x768xbf16>
    %c128_51 = arith.constant 128 : index
    %c0_52 = arith.constant 0 : index
    %87 = vector.load %arg10[%c128_51, %c0_52] : memref<144x768xbf16, #tpu.memory_space<vmem>>, vector<16x768xbf16>
    tpu.vector_store %arg10[%c128_51, %c0_52], %86 {strides = array<i32>} : memref<144x768xbf16, #tpu.memory_space<vmem>>, vector<16x768xbf16>,
    %c0_53 = arith.constant 0 : index
    %c0_54 = arith.constant 0 : index
    %88 = vector.load %arg4[%c0_53, %c0_54] : memref<16x144xbf16, #tpu.memory_space<vmem>>, vector<16x144xbf16>
    %c0_55 = arith.constant 0 : index
    %c0_56 = arith.constant 0 : index
    %89 = vector.load %arg10[%c0_55, %c0_56] : memref<144x768xbf16, #tpu.memory_space<vmem>>, vector<144x768xbf16>
    %cst_57 = arith.constant dense<0.000000e+00> : vector<16x768xf32>
    %90 = tpu.matmul %88, %89, %cst_57 {dimension_numbers = #tpu.dot_dimension_numbers<[1], [0], [0], [1], [0, 0, 1, 1], [], []>} : vector<16x144xbf16>, vector<144x768xbf16>, vector<16x768xf32> -> vector<16x768xf32>
    %c0_58 = arith.constant 0 : index
    %c0_59 = arith.constant 0 : index
    %91 = vector.load %arg5[%c0_58, %c0_59] : memref<16x1xf32, #tpu.memory_space<vmem>>, vector<16x1xf32>
    %c0_60 = arith.constant 0 : index
    %c0_61 = arith.constant 0 : index
    %92 = vector.load %arg6[%c0_60, %c0_61] : memref<16x1xf32, #tpu.memory_space<vmem>>, vector<16x1xf32>
    %93 = vector.broadcast %0 : vector<1x768xf32> to vector<16x768xf32>
    %94 = arith.mulf %90, %93 : vector<16x768xf32>
    %cst_62 = arith.constant dense<0.000000e+00> : vector<16xf32>
    %95 = vector.multi_reduction <add>, %94, %cst_62 [1] : vector<16x768xf32> to vector<16xf32>
    %96 = vector.shape_cast %95 : vector<16xf32> to vector<16x1xf32>
    %cst_63 = arith.constant 0.001953125 : f32
    %97 = vector.broadcast %cst_63 : f32 to vector<16x1xf32>
    %98 = arith.mulf %96, %97 : vector<16x1xf32>
    %99 = vector.broadcast %98 : vector<16x1xf32> to vector<16x768xf32>
    %100 = arith.subf %90, %99 : vector<16x768xf32>
    %101 = vector.broadcast %0 : vector<1x768xf32> to vector<16x768xf32>
    %102 = arith.mulf %100, %101 : vector<16x768xf32>
    %103 = arith.mulf %102, %102 : vector<16x768xf32>
    %cst_64 = arith.constant dense<0.000000e+00> : vector<16xf32>
    %104 = vector.multi_reduction <add>, %103, %cst_64 [1] : vector<16x768xf32> to vector<16xf32>
    %105 = vector.shape_cast %104 : vector<16xf32> to vector<16x1xf32>
    %cst_65 = arith.constant 0.001953125 : f32
    %106 = vector.broadcast %cst_65 : f32 to vector<16x1xf32>
    %107 = arith.mulf %105, %106 : vector<16x1xf32>
    %cst_66 = arith.constant 9.99999974E-6 : f32
    %108 = vector.broadcast %cst_66 : f32 to vector<16x1xf32>
    %109 = arith.addf %107, %108 : vector<16x1xf32>
    %110 = math.rsqrt %109 : vector<16x1xf32>
    %111 = arith.mulf %91, %110 : vector<16x1xf32>
    %112 = arith.mulf %98, %111 : vector<16x1xf32>
    %113 = arith.subf %92, %112 : vector<16x1xf32>
    %114 = vector.broadcast %111 : vector<16x1xf32> to vector<16x768xf32>
    %115 = arith.mulf %90, %114 : vector<16x768xf32>
    %116 = vector.broadcast %113 : vector<16x1xf32> to vector<16x768xf32>
    %117 = arith.addf %115, %116 : vector<16x768xf32>
    %cst_67 = arith.constant 0.000000e+00 : f32
    %118 = vector.broadcast %cst_67 : f32 to vector<16x768xf32>
    %119 = arith.maximumf %117, %118 : vector<16x768xf32>
    %c0_68 = arith.constant 0 : index
    %c0_69 = arith.constant 0 : index
    %120 = vector.load %arg8[%c0_68, %c0_69] : memref<16x768xf32, #tpu.memory_space<vmem>>, vector<16x768xf32>
    tpu.vector_store %arg8[%c0_68, %c0_69], %119 {strides = array<i32>} : memref<16x768xf32, #tpu.memory_space<vmem>>, vector<16x768xf32>,
    return
  }
}

</mosaic_0001>

<bundles_post_ra>
// kernel: tpu_custom_call.1
= control target key start
LH: loop header
LB: loop body
LE: loop exit
PB: predicated region body
PF: predicated region fallthrough
CT: control target
= control target key end

     0   :  { %13 = vsyncpa [#allocation5], 0  ;;  %s3638_s0 = inlined_call_operand.hbm [shape: f32[16,768], index: 0, kind: input, shape index: {}]   ;;  %s3639_s1 = inlined_call_operand.vmem [shape: bf16[16,144], index: 1, kind: input, shape index: {}]   ;;  %s3640_s2 = inlined_call_operand.vmem [shape: f32[16,1], index: 2, kind: input, shape index: {}]   ;;  %s3641_s3 = inlined_call_operand.vmem [shape: f32[16,1], index: 3, kind: input, shape index: {}]   ;;  %s3642_s4 = inlined_call_operand.vmem [shape: bf16[16,144], index: 4, kind: input, shape index: {}]   ;;  %s3643_s5 = inlined_call_operand.vmem [shape: f32[16,1], index: 5, kind: input, shape index: {}]   ;;  %s3644_s6 = inlined_call_operand.vmem [shape: f32[16,1], index: 6, kind: input, shape index: {}]   ;;  %s3645_s7 = inlined_call_operand.vmem [shape: f32[1,768], index: 7, kind: input, shape index: {}]   ;;  %s3646_s8 = inlined_call_operand.hbm [shape: f32[16,768], index: 8, kind: output, shape index: {}]  }
   0x1   :  { %14 = vsyncpa [#allocation6], 0  ;;  %s2194_s27 = smov [#allocation4]   ;;  %s2146_s9 = scalar_lea.hbm %s3638_s0, 1536 }
   0x2   :  { %s20_s28 = sshll.u32 %s2194_s27, 4  ;;  %p2147_p0 = scmp.ne.s32.totalorder %s3638_s0, %s2146_s9  ;;  %s21_s28 = int_to_ptr.vmem [resolvable:$true] %s20_s28 }
   0x3   :  { %p2150_p1 = scmp.lt.u32.totalorder %s2146_s9, %s3638_s0 }
   0x5   :  { %p2152_p2 = pnand %p2150_p1, %p2147_p0 }
   0x7   :  { %2155 = shalt.err (!%p2152_p2)
}
   0x8   :  { %s2156_s14 = scalar_lea.vmem %s21_s28, 1536  ;;  %p2161_p4 = scmp.lt.s32.totalorder %s21_s28, %s21_s28 }
   0x9   :  { %p2157_p3 = scmp.ne.s32.totalorder %s21_s28, %s2156_s14  ;;  %p2162_p5 = scmp.lt.s32.totalorder %s2156_s14, %s2156_s14 }
   0xb   :  { %p2163_p6 = por %p2162_p5, %p2161_p4 }
   0xd   :  { %p2164_p7 = pnand %p2163_p6, %p2157_p3 }
   0xf   :  { %2167 = shalt.err (!%p2164_p7)
}
  0x10   :  { %s2195_s15 = smov 768   ;;  %s2196_s16 = smov 48  }
  0x11   :  { %26 = dma.hbm_to_vmem [thread:$0]  %s3638_s0, 1536, %s21_s28, [#allocation5], %s2195_s15, %s2195_s15, %s2196_s16  }
  0x12   :  { %2190 = dma.done.wait [#allocation5], 1536  }
  0x13   :  { %2191 = vsyncadd [#allocation5], 4294965760  ;;  %v2267_v0 = vld [vmem:[#allocation4 + $0x28] sm:$0xff]  ;;  %v2269_v1 = vld [vmem:[#allocation4 + $0x58] sm:$0xff]  ;;  %s2197_s0 = smov 19   ;;  %s2198_s19 = smov 18   ;;  %v3647_v24 = vlaneseq }
  0x14   :  { %v2271_v2 = vld [vmem:[#allocation4] sm:$0xff]  ;;  %v2275_v3 = vpack.i.bf16 %v2269_v1, %v2267_v0  ;;  %v2277_v4 = vld [vmem:[#allocation4 + $0x30] sm:$0xff]  ;;  %v2279_v5 = vld [vmem:[#allocation4 + $0x8] sm:$0xff]  ;;  %s2199_s20 = smov 17   ;;  %s2200_s21 = smov 1   ;;  %vm529_vm0 = vcmask 130048  }
  0x15   :  { %v2281_v6 = vld [vmem:[#allocation4 + $0x38] sm:$0xff]  ;;  %v1650_v7 = vpack.i.bf16 %v2277_v4, %v2271_v2  ;;  %v256_v10 = vpack.c.bf16 %v2277_v4, %v2271_v2  ;;  %v2304_v11 = vld [vmem:[#allocation4 + $0x10] sm:$0xff]  ;;  %v2306_v12 = vld [vmem:[#allocation4 + $0x40] sm:$0xff]  ;;  %s2201_s22 = smov 127   ;;  %s2202_s23 = smov 111   ;;  %v2383_v26 = vand.u32 127, %v3647_v24 }
  0x16   :  { %1661 = vrot.lane.b32.xlu1 %v2275_v3, %s2197_s0  ;;  %v1655_v8 = vpack.i.bf16 %v2281_v6, %v2279_v5  ;;  %v257_v9 = vpack.c.bf16 %v2281_v6, %v2279_v5  ;;  %v1715_v13 = vpack.i.bf16 %v2306_v12, %v2304_v11  ;;  %s2203_s24 = smov 110   ;;  %v2321_v14 = vld [vmem:[#allocation4 + $0x18] sm:$0xff]  ;;  %v2323_v15 = vld [vmem:[#allocation4 + $0x48] sm:$0xff]  ;;  %s2204_s27 = smov 109   ;;  %v2338_v18 = vld [vmem:[#allocation4 + $0x20] sm:$0xff]  ;;  %v258_v22 = vpack.c.bf16 %v2306_v12, %v2304_v11 }
  0x17   :  { %1651 = vrot.lane.b32.xlu0 %v1650_v7, %s2197_s0  ;;  %v1760_v16 = vpack.i.bf16 %v2323_v15, %v2321_v14  ;;  %v2332_v17 = vld [vmem:[%s3639_s1 + $0x4] ss:$8 sps:$4 sm:$0xff]   ;;  %v2340_v19 = vld [vmem:[#allocation4 + $0x50] sm:$0xff]  ;;  %v259_v21 = vpack.c.bf16 %v2323_v15, %v2321_v14  ;;  %vm84_vm1 = vcmp.lt.s32.totalorder %v2383_v26, 19  ;;  %vm133_vm2 = vcmp.lt.s32.totalorder %v2383_v26, 18 }
  0x18   :  { %1629 = vmatprep.mubr.msk.bf16.mxu0 %vm529_vm0, %v2332_v17  ;;  %1630 = vmatprep.mubr.msk.bf16.mxu1 %vm529_vm0, %v2332_v17  ;;  %v1780_v20 = vpack.i.bf16 %v2340_v19, %v2338_v18  ;;  %vm182_vm3 = vcmp.lt.s32.totalorder %v2383_v26, 17  ;;  %vm231_vm4 = vcmp.lt.s32.totalorder %v2383_v26, 1  ;;  %vm292_vm5 = vcmp.lt.s32.totalorder %v2383_v26, 127 }
  0x19   :  { %vm341_vm6 = vcmp.lt.s32.totalorder %v2383_v26, 111  ;;  %vm390_vm7 = vcmp.lt.s32.totalorder %v2383_v26, 110  ;;  %vm439_vm8 = vcmp.lt.s32.totalorder %v2383_v26, 109 }
  0x1a   :  { %1666 = vrot.lane.b32.xlu1 %v1650_v7, %s2198_s19 }
  0x1b   :  { %1656 = vrot.lane.b32.xlu0 %v1655_v8, %s2197_s0 }
  0x1e   :  { %1676 = vrot.lane.b32.xlu1 %v2275_v3, %s2198_s19 }
  0x1f   :  { %1671 = vrot.lane.b32.xlu0 %v1655_v8, %s2198_s19 }
  0x22   :  { %1686 = vrot.lane.b32.xlu1 %v1655_v8, %s2199_s20 }
  0x23   :  { %1681 = vrot.lane.b32.xlu0 %v1650_v7, %s2199_s20 }
  0x26   :  { %1696 = vrot.lane.b32.xlu1 %v1650_v7, %s2200_s21 }
  0x27   :  { %1691 = vrot.lane.b32.xlu0 %v2275_v3, %s2199_s20 }
  0x2a   :  { %1706 = vrot.lane.b32.xlu1 %v2275_v3, %s2200_s21 }
  0x2b   :  { %1701 = vrot.lane.b32.xlu0 %v1655_v8, %s2200_s21 }
  0x2e   :  { %1716 = vrot.lane.b32.xlu1 %v1715_v13, %s2201_s22 }
  0x2f   :  { %1711 = vrot.lane.b32.xlu0 %v1655_v8, %s2201_s22 }
  0x32   :  { %1726 = vrot.lane.b32.xlu1 %v1655_v8, %s2202_s23 }
  0x33   :  { %1721 = vrot.lane.b32.xlu0 %v1650_v7, %s2201_s22 }
  0x36   :  { %1736 = vrot.lane.b32.xlu1 %v1650_v7, %s2202_s23 }
  0x37   :  { %1731 = vrot.lane.b32.xlu0 %v1715_v13, %s2202_s23 }
  0x3a   :  { %1746 = vrot.lane.b32.xlu1 %v1715_v13, %s2203_s24 }
  0x3b   :  { %1741 = vrot.lane.b32.xlu0 %v1655_v8, %s2203_s24 }
  0x3e   :  { %1756 = vrot.lane.b32.xlu1 %v1715_v13, %s2197_s0 }
  0x3f   :  { %1751 = vrot.lane.b32.xlu0 %v1650_v7, %s2203_s24 }
  0x42   :  { %1766 = vrot.lane.b32.xlu1 %v1655_v8, %s2204_s27 }
  0x43   :  { %1761 = vrot.lane.b32.xlu0 %v1760_v16, %s2197_s0 }
  0x46   :  { %1776 = vrot.lane.b32.xlu1 %v1650_v7, %s2204_s27 }
  0x47   :  { %1771 = vrot.lane.b32.xlu0 %v1715_v13, %s2204_s27 }
  0x4a   :  { %1786 = vrot.lane.b32.xlu1 %v1715_v13, %s2198_s19 }
  0x4b   :  { %1781 = vrot.lane.b32.xlu0 %v1780_v20, %s2197_s0 }
  0x4e   :  { %1796 = vrot.lane.b32.xlu1 %v1780_v20, %s2198_s19 }
  0x4f   :  { %1791 = vrot.lane.b32.xlu0 %v1760_v16, %s2198_s19 }
  0x52   :  { %1806 = vrot.lane.b32.xlu1 %v1760_v16, %s2199_s20 }
  0x53   :  { %1801 = vrot.lane.b32.xlu0 %v1715_v13, %s2199_s20 }
  0x56   :  { %1816 = vrot.lane.b32.xlu1 %v1715_v13, %s2200_s21 }
  0x57   :  { %1811 = vrot.lane.b32.xlu0 %v1780_v20, %s2199_s20 }
  0x5a   :  { %1826 = vrot.lane.b32.xlu1 %v1780_v20, %s2200_s21 }
  0x5b   :  { %1821 = vrot.lane.b32.xlu0 %v1760_v16, %s2200_s21 }
  0x5e   :  { %1836 = vrot.lane.b32.xlu1 %v1780_v20, %s2201_s22 }
  0x5f   :  { %1831 = vrot.lane.b32.xlu0 %v1760_v16, %s2201_s22 }
  0x62   :  { %1846 = vrot.lane.b32.xlu1 %v1760_v16, %s2202_s23 }
  0x63   :  { %1841 = vrot.lane.b32.xlu0 %v2275_v3, %s2201_s22 }
  0x66   :  { %1856 = vrot.lane.b32.xlu1 %v2275_v3, %s2202_s23 }
  0x67   :  { %1851 = vrot.lane.b32.xlu0 %v1780_v20, %s2202_s23 }
  0x6a   :  { %1866 = vrot.lane.b32.xlu1 %v1780_v20, %s2203_s24 }
  0x6b   :  { %1861 = vrot.lane.b32.xlu0 %v1760_v16, %s2203_s24 }
  0x6e   :  { %1876 = vrot.lane.b32.xlu1 %v1760_v16, %s2204_s27 }
  0x6f   :  { %1871 = vrot.lane.b32.xlu0 %v2275_v3, %s2203_s24 }
  0x72   :  { %1886 = vrot.lane.b32.xlu1 %v2275_v3, %s2204_s27 }
  0x73   :  { %1881 = vrot.lane.b32.xlu0 %v1780_v20, %s2204_s27 }
  0x88   :  { %v2380_v25 = vpop.permute.xlu1 %1661 }
  0x89   :  { %v1652_v27 = vpop.permute.xlu0 %1651  ;;  %v1664_v28 = vunpack.i.h.bf16 %v2380_v25  ;;  %v1663_v29 = vunpack.i.l.bf16 %v2380_v25 }
  0x8a   :  { %v1654_v30 = vunpack.i.h.bf16 %v1652_v27  ;;  %v1653_v31 = vunpack.i.l.bf16 %v1652_v27 }
  0x8c   :  { %v1667_v32 = vpop.permute.xlu1 %1666  ;;  %v95_v38 = vsel %vm84_vm1, %v1663_v29, %v1653_v31  ;;  %v96_v39 = vsel %vm84_vm1, %v1664_v28, %v1654_v30 }
  0x8d   :  { %v2388_v33 = vpop.permute.xlu0 %1656  ;;  %v1669_v36 = vunpack.i.h.bf16 %v1667_v32  ;;  %v1668_v37 = vunpack.i.l.bf16 %v1667_v32  ;;  %v97_v49 = vpack.c.bf16 %v96_v39, %v95_v38 }
  0x8e   :  { %v1659_v34 = vunpack.i.h.bf16 %v2388_v33  ;;  %v1658_v35 = vunpack.i.l.bf16 %v2388_v33 }
  0x90   :  { %v2400_v40 = vpop.permute.xlu1 %1676  ;;  %v93_v41 = vsel %vm84_vm1, %v1653_v31, %v1658_v35  ;;  %v94_v42 = vsel %vm84_vm1, %v1654_v30, %v1659_v34 }
  0x91   :  { %v1679_v43 = vunpack.i.h.bf16 %v2400_v40  ;;  %v1678_v44 = vunpack.i.l.bf16 %v2400_v40  ;;  %v2413_v45 = vpop.permute.xlu0 %1671  ;;  %v98_v46 = vpack.c.bf16 %v94_v42, %v93_v41 }
  0x92   :  { %v1674_v47 = vunpack.i.h.bf16 %v2413_v45  ;;  %v1673_v48 = vunpack.i.l.bf16 %v2413_v45 }
  0x93   :  { %533 = vmatprep.subr.bf16.mxu0 %v98_v46  ;;  %v144_v50 = vsel %vm133_vm2, %v1678_v44, %v1668_v37  ;;  %v145_v51 = vsel %vm133_vm2, %v1679_v43, %v1669_v36 }
  0x94   :  { %534 = vmatpush1.bf16.msra.mxu0 %v97_v49  ;;  %v2425_v52 = vpop.permute.xlu1 %1686  ;;  %v142_v53 = vsel %vm133_vm2, %v1668_v37, %v1673_v48  ;;  %v143_v54 = vsel %vm133_vm2, %v1669_v36, %v1674_v47  ;;  %v146_v55 = vpack.c.bf16 %v145_v51, %v144_v50 }
  0x95   :  { %v1689_v56 = vunpack.i.h.bf16 %v2425_v52  ;;  %v1688_v57 = vunpack.i.l.bf16 %v2425_v52  ;;  %v1682_v58 = vpop.permute.xlu0 %1681  ;;  %v147_v59 = vpack.c.bf16 %v143_v54, %v142_v53 }
  0x96   :  { %v1684_v60 = vunpack.i.h.bf16 %v1682_v58  ;;  %v1683_v61 = vunpack.i.l.bf16 %v1682_v58 }
  0x97   :  { %535 = vmatprep.subr.bf16.mxu0 %v147_v59 }
  0x98   :  { %536 = vmatpush1.bf16.msra.mxu0 %v146_v55  ;;  %v1697_v62 = vpop.permute.xlu1 %1696  ;;  %v191_v63 = vsel %vm182_vm3, %v1683_v61, %v1688_v57  ;;  %v192_v3 = vsel %vm182_vm3, %v1684_v60, %v1689_v56 }
  0x99   :  { %v2446_v7 = vpop.permute.xlu0 %1691  ;;  %v196_v8 = vpack.c.bf16 %v192_v3, %v191_v63  ;;  %v1699_v20 = vunpack.i.h.bf16 %v1697_v62  ;;  %v1698_v27 = vunpack.i.l.bf16 %v1697_v62 }
  0x9a   :  { %v1694_v13 = vunpack.i.h.bf16 %v2446_v7  ;;  %v1693_v16 = vunpack.i.l.bf16 %v2446_v7 }
  0x9b   :  { %537 = vmatprep.subr.bf16.mxu0 %v196_v8 }
  0x9c   :  { %v2450_v30 = vpop.permute.xlu1 %1706  ;;  %v193_v31 = vsel %vm182_vm3, %v1693_v16, %v1683_v61  ;;  %v194_v32 = vsel %vm182_vm3, %v1694_v13, %v1684_v60 }
  0x9d   :  { %v1709_v36 = vunpack.i.h.bf16 %v2450_v30  ;;  %v1708_v37 = vunpack.i.l.bf16 %v2450_v30  ;;  %v2463_v38 = vpop.permute.xlu0 %1701  ;;  %v195_v39 = vpack.c.bf16 %v194_v32, %v193_v31 }
  0x9e   :  { %v1704_v41 = vunpack.i.h.bf16 %v2463_v38  ;;  %v1703_v42 = vunpack.i.l.bf16 %v2463_v38 }
  0x9f   :  { %538 = vmatpush1.bf16.msra.mxu0 %v195_v39  ;;  %v242_v46 = vsel %vm231_vm4, %v1708_v37, %v1698_v27  ;;  %v243_v49 = vsel %vm231_vm4, %v1709_v36, %v1699_v20 }
  0xa0   :  { %v2475_v50 = vpop.permute.xlu1 %1716  ;;  %v240_v51 = vsel %vm231_vm4, %v1698_v27, %v1703_v42  ;;  %v241_v53 = vsel %vm231_vm4, %v1699_v20, %v1704_v41  ;;  %v244_v54 = vpack.c.bf16 %v243_v49, %v242_v46 }
  0xa1   :  { %v1719_v55 = vunpack.i.h.bf16 %v2475_v50  ;;  %v1718_v58 = vunpack.i.l.bf16 %v2475_v50  ;;  %v1712_v59 = vpop.permute.xlu0 %1711  ;;  %v245_v60 = vpack.c.bf16 %v241_v53, %v240_v51 }
  0xa2   :  { %v1714_v61 = vunpack.i.h.bf16 %v1712_v59  ;;  %v1713_v62 = vunpack.i.l.bf16 %v1712_v59 }
  0xa3   :  { %539 = vmatprep.subr.bf16.mxu0 %v245_v60 }
  0xa4   :  { %540 = vmatpush1.bf16.msra.mxu0 %v244_v54  ;;  %v1727_v63 = vpop.permute.xlu1 %1726  ;;  %v299_v3 = vsel %vm292_vm5, %v1713_v62, %v1718_v58  ;;  %v300_v8 = vsel %vm292_vm5, %v1714_v61, %v1719_v55 }
  0xa5   :  { %v2496_v20 = vpop.permute.xlu0 %1721  ;;  %541 = vmatprep.subr.bf16.mxu0 %v257_v9  ;;  %v1729_v32 = vunpack.i.h.bf16 %v1727_v63  ;;  %v1728_v39 = vunpack.i.l.bf16 %v1727_v63  ;;  %v306_v46 = vpack.c.bf16 %v300_v8, %v299_v3 }
  0xa6   :  { %v3657_v27 = vunpack.i.h.bf16 %v2496_v20  ;;  %v1723_v31 = vunpack.i.l.bf16 %v2496_v20  ;;  %v3678_v50 = vunpack.i.h.bf16 %v2496_v20 }
  0xa8   :  { %542 = vmatpush1.bf16.msra.mxu0 %v256_v10  ;;  %v2506_v49 = vpop.permute.xlu1 %1736  ;;  %v301_v51 = vsel %vm292_vm5, %v1723_v31, %v1713_v62  ;;  %v302_v5 = vsel %vm292_vm5, %v3657_v27, %v1714_v61 }
  0xa9   :  { %v3652_v6 = vunpack.i.h.bf16 %v2506_v49  ;;  %v3653_v9 = vunpack.i.l.bf16 %v2506_v49  ;;  %v2519_v2 = vpop.permute.xlu0 %1731  ;;  %543 = vmatprep.subr.bf16.mxu0 %v306_v46  ;;  %v305_v4 = vpack.c.bf16 %v302_v5, %v301_v51 }
  0xaa   :  { %v3650_v10 = vunpack.i.h.bf16 %v2519_v2  ;;  %v3651_v53 = vunpack.i.l.bf16 %v2519_v2 }
  0xab   :  { %v350_v54 = vsel %vm341_vm6, %v3653_v9, %v1728_v39  ;;  %v351_v59 = vsel %vm341_vm6, %v3652_v6, %v1729_v32 }
  0xac   :  { %544 = vmatpush1.bf16.msra.mxu0 %v305_v4  ;;  %v2531_v60 = vpop.permute.xlu1 %1746  ;;  %v348_v61 = vsel %vm341_vm6, %v1728_v39, %v3651_v53  ;;  %v349_v62 = vsel %vm341_vm6, %v1729_v32, %v3650_v10  ;;  %v354_v63 = vpack.c.bf16 %v351_v59, %v350_v54 }
  0xad   :  { %v3649_v3 = vunpack.i.h.bf16 %v2531_v60  ;;  %v3648_v8 = vunpack.i.l.bf16 %v2531_v60  ;;  %v1742_v46 = vpop.permute.xlu0 %1741  ;;  %v355_v51 = vpack.c.bf16 %v349_v62, %v348_v61 }
  0xae   :  { %v1744_v5 = vunpack.i.h.bf16 %v1742_v46  ;;  %v1743_v4 = vunpack.i.l.bf16 %v1742_v46 }
  0xaf   :  { %545 = vmatprep.subr.bf16.mxu0 %v355_v51 }
  0xb0   :  { %546 = vmatpush1.bf16.msra.mxu0 %v354_v63  ;;  %v1757_v24 = vpop.permute.xlu1 %1756  ;;  %v397_v39 = vsel %vm390_vm7, %v1743_v4, %v3648_v8  ;;  %v398_v32 = vsel %vm390_vm7, %v1744_v5, %v3649_v3 }
  0xb1   :  { %v2552_v54 = vpop.permute.xlu0 %1751  ;;  %v404_v59 = vpack.c.bf16 %v398_v32, %v397_v39  ;;  %v1759_v46 = vunpack.i.h.bf16 %v1757_v24  ;;  %v1758_v63 = vunpack.i.l.bf16 %v1757_v24 }
  0xb2   :  { %v3654_v61 = vunpack.i.h.bf16 %v2552_v54  ;;  %v3656_v62 = vunpack.i.l.bf16 %v2552_v54 }
  0xb3   :  { %547 = vmatprep.subr.bf16.mxu0 %v404_v59  ;;  %v91_v24 = vsel %vm84_vm1, %v1658_v35, %v1758_v63 }
  0xb4   :  { %v1767_v51 = vpop.permute.xlu1 %1766  ;;  %v399_v8 = vsel %vm390_vm7, %v3656_v62, %v1743_v4  ;;  %v400_v3 = vsel %vm390_vm7, %v3654_v61, %v1744_v5  ;;  %v92_v4 = vsel %vm84_vm1, %v1659_v34, %v1759_v46 }
  0xb5   :  { %v1762_v10 = vpop.permute.xlu0 %1761  ;;  %v403_v39 = vpack.c.bf16 %v400_v3, %v399_v8  ;;  %v1769_v6 = vunpack.i.h.bf16 %v1767_v51  ;;  %v1768_v9 = vunpack.i.l.bf16 %v1767_v51 }
  0xb6   :  { %v1764_v32 = vunpack.i.h.bf16 %v1762_v10  ;;  %v1763_v53 = vunpack.i.l.bf16 %v1762_v10 }
  0xb7   :  { %548 = vmatpush1.bf16.msra.mxu0 %v403_v39  ;;  %v99_v39 = vpack.c.bf16 %v92_v4, %v91_v24 }
  0xb8   :  { %v2572_v59 = vpop.permute.xlu1 %1776  ;;  %v89_v3 = vsel %vm84_vm1, %v1758_v63, %v1763_v53  ;;  %v90_v10 = vsel %vm84_vm1, %v1759_v46, %v1764_v32 }
  0xb9   :  { %v1779_v8 = vunpack.i.h.bf16 %v2572_v59  ;;  %v3655_v5 = vunpack.i.l.bf16 %v2572_v59  ;;  %v2581_v35 = vpop.permute.xlu0 %1771  ;;  %v100_v33 = vpack.c.bf16 %v90_v10, %v89_v3 }
  0xba   :  { %v3659_v51 = vunpack.i.h.bf16 %v2581_v35  ;;  %v3658_v34 = vunpack.i.l.bf16 %v2581_v35 }
  0xbb   :  { %576 = vmatprep.subr.bf16.mxu1 %v100_v33  ;;  %v448_v46 = vsel %vm439_vm8, %v3655_v5, %v1768_v9  ;;  %v449_v63 = vsel %vm439_vm8, %v1779_v8, %v1769_v6 }
  0xbc   :  { %577 = vmatpush1.bf16.msra.mxu1 %v99_v39  ;;  %v1787_v61 = vpop.permute.xlu1 %1786  ;;  %v446_v3 = vsel %vm439_vm8, %v1768_v9, %v3658_v34  ;;  %v447_v24 = vsel %vm439_vm8, %v1769_v6, %v3659_v51  ;;  %v452_v4 = vpack.c.bf16 %v449_v63, %v448_v46  ;;  %v2604_v39 = vld [vmem:[%s3639_s1] ss:$8 sps:$4 sm:$0xff]  }
  0xbd   :  { %v1782_v10 = vpop.permute.xlu0 %1781  ;;  %v453_v33 = vpack.c.bf16 %v447_v24, %v446_v3  ;;  %v1788_v5 = vunpack.i.l.bf16 %v1787_v61  ;;  %v1789_v27 = vunpack.i.h.bf16 %v1787_v61 }
  0xbe   :  { %v1784_v62 = vunpack.i.h.bf16 %v1782_v10  ;;  %v1783_v23 = vunpack.i.l.bf16 %v1782_v10 }
  0xbf   :  { %549 = vmatprep.subr.bf16.mxu0 %v453_v33 }
  0xc0   :  { %v87_v9 = vsel %vm84_vm1, %v1763_v53, %v1783_v23  ;;  %v88_v34 = vsel %vm84_vm1, %v1764_v32, %v1784_v62  ;;  %550 = vmatpush1.bf16.msra.mxu0 %v452_v4  ;;  %v1797_v6 = vpop.permute.xlu1 %1796  ;;  %v85_v46 = vsel %vm84_vm1, %v1783_v23, %v1663_v29  ;;  %v86_v61 = vsel %vm84_vm1, %v1784_v62, %v1664_v28 }
  0xc1   :  { %v101_v63 = vpack.c.bf16 %v88_v34, %v87_v9  ;;  %v1799_v3 = vunpack.i.h.bf16 %v1797_v6  ;;  %v1798_v24 = vunpack.i.l.bf16 %v1797_v6  ;;  %v1792_v10 = vpop.permute.xlu0 %1791  ;;  %v102_v53 = vpack.c.bf16 %v86_v61, %v85_v46 }
  0xc2   :  { %v1794_v33 = vunpack.i.h.bf16 %v1792_v10  ;;  %v1793_v51 = vunpack.i.l.bf16 %v1792_v10  ;;  %v140_v32 = vsel %vm133_vm2, %v1673_v48, %v1788_v5  ;;  %v141_v28 = vsel %vm133_vm2, %v1674_v47, %v1789_v27 }
  0xc3   :  { %619 = vmatprep.subr.bf16.mxu0 %v102_v53  ;;  %566 = vmatmul.mubr.bf16.vlgmr.msra.gmra.mrb[0].mxu0 %v2604_v39  ;;  %v134_v23 = vsel %vm133_vm2, %v1798_v24, %v1678_v44  ;;  %v135_v25 = vsel %vm133_vm2, %v1799_v3, %v1679_v43  ;;  %v148_v61 = vpack.c.bf16 %v141_v28, %v140_v32 }
  0xc4   :  { %v137_v29 = vsel %vm133_vm2, %v1794_v33, %v1799_v3  ;;  %v136_v48 = vsel %vm133_vm2, %v1793_v51, %v1798_v24  ;;  %620 = vmatpush1.bf16.msra.mxu0 %v101_v63  ;;  %v1807_v62 = vpop.permute.xlu1 %1806  ;;  %v138_v44 = vsel %vm133_vm2, %v1788_v5, %v1793_v51  ;;  %v139_v40 = vsel %vm133_vm2, %v1789_v27, %v1794_v33 }
  0xc5   :  { %v150_v43 = vpack.c.bf16 %v137_v29, %v136_v48  ;;  %v1809_v34 = vunpack.i.h.bf16 %v1807_v62  ;;  %v1808_v45 = vunpack.i.l.bf16 %v1807_v62  ;;  %v1802_v4 = vpop.permute.xlu0 %1801  ;;  %v149_v9 = vpack.c.bf16 %v139_v40, %v138_v44  ;;  %1631 = vmatprep.mubr.msk.bf16.mxu0 %vm529_vm0, %v2332_v17 }
  0xc6   :  { %v1804_v47 = vunpack.i.h.bf16 %v1802_v4  ;;  %v1803_v6 = vunpack.i.l.bf16 %v1802_v4  ;;  %v151_v46 = vpack.c.bf16 %v135_v25, %v134_v23 }
  0xc7   :  { %578 = vmatprep.subr.bf16.mxu1 %v149_v9 }
  0xc8   :  { %621 = vmatprep.subr.bf16.mxu0 %v151_v46  ;;  %579 = vmatpush1.bf16.msra.mxu1 %v148_v61  ;;  %v1817_v63 = vpop.permute.xlu1 %1816  ;;  %v187_v5 = vsel %vm182_vm3, %v1803_v6, %v1808_v45  ;;  %v188_v27 = vsel %vm182_vm3, %v1804_v47, %v1809_v34  ;;  %v189_v51 = vsel %vm182_vm3, %v1688_v57, %v1803_v6 }
  0xc9   :  { %622 = vmatpush1.bf16.msra.mxu0 %v150_v43  ;;  %v1812_v17 = vpop.permute.xlu0 %1811  ;;  %v198_v3 = vpack.c.bf16 %v188_v27, %v187_v5  ;;  %v190_v24 = vsel %vm182_vm3, %v1689_v56, %v1804_v47  ;;  %v1819_v32 = vunpack.i.h.bf16 %v1817_v63  ;;  %v1818_v23 = vunpack.i.l.bf16 %v1817_v63 }
  0xca   :  { %v1814_v10 = vunpack.i.h.bf16 %v1812_v17  ;;  %v1813_v53 = vunpack.i.l.bf16 %v1812_v17  ;;  %v197_v33 = vpack.c.bf16 %v190_v24, %v189_v51 }
  0xcb   :  { %580 = vmatprep.subr.bf16.mxu1 %v198_v3 }
  0xcc   :  { %v186_v25 = vsel %vm182_vm3, %v1809_v34, %v1814_v10  ;;  %v185_v57 = vsel %vm182_vm3, %v1808_v45, %v1813_v53  ;;  %581 = vmatpush1.bf16.msra.mxu1 %v197_v33  ;;  %v1827_v28 = vpop.permute.xlu1 %1826  ;;  %v183_v52 = vsel %vm182_vm3, %v1813_v53, %v1693_v16  ;;  %v184_v56 = vsel %vm182_vm3, %v1814_v10, %v1694_v13 }
  0xcd   :  { %v199_v29 = vpack.c.bf16 %v186_v25, %v185_v57  ;;  %v1829_v48 = vunpack.i.h.bf16 %v1827_v28  ;;  %v1828_v62 = vunpack.i.l.bf16 %v1827_v28  ;;  %v1822_v44 = vpop.permute.xlu0 %1821  ;;  %v200_v40 = vpack.c.bf16 %v184_v56, %v183_v52 }
  0xce   :  { %v1824_v43 = vunpack.i.h.bf16 %v1822_v44  ;;  %v1823_v34 = vunpack.i.l.bf16 %v1822_v44  ;;  %v261_v45 = vpack.c.bf16 %v2269_v1, %v2267_v0  ;;  %v238_v13 = vsel %vm231_vm4, %v1703_v42, %v1818_v23 }
  0xcf   :  { %623 = vmatprep.subr.bf16.mxu0 %v200_v40  ;;  %v232_v16 = vsel %vm231_vm4, %v1828_v62, %v1708_v37  ;;  %v233_v7 = vsel %vm231_vm4, %v1829_v48, %v1709_v36  ;;  %v239_v0 = vsel %vm231_vm4, %v1704_v41, %v1819_v32  ;;  %v3679_v57 = vpack.c.bf16 %v2340_v19, %v2338_v18 }
  0xd0   :  { %v235_v1 = vsel %vm231_vm4, %v1824_v43, %v1829_v48  ;;  %v234_v37 = vsel %vm231_vm4, %v1823_v34, %v1828_v62  ;;  %624 = vmatpush1.bf16.msra.mxu0 %v199_v29  ;;  %v1837_v30 = vpop.permute.xlu1 %1836  ;;  %v236_v36 = vsel %vm231_vm4, %v1818_v23, %v1823_v34  ;;  %v237_v4 = vsel %vm231_vm4, %v1819_v32, %v1824_v43 }
  0xd1   :  { %v248_v42 = vpack.c.bf16 %v235_v1, %v234_v37  ;;  %v1839_v9 = vunpack.i.h.bf16 %v1837_v30  ;;  %v1838_v38 = vunpack.i.l.bf16 %v1837_v30  ;;  %v1832_v47 = vpop.permute.xlu0 %1831  ;;  %v247_v6 = vpack.c.bf16 %v237_v4, %v236_v36 }
  0xd2   :  { %v1834_v41 = vunpack.i.h.bf16 %v1832_v47  ;;  %v1833_v46 = vunpack.i.l.bf16 %v1832_v47  ;;  %v249_v61 = vpack.c.bf16 %v233_v7, %v232_v16  ;;  %v246_v63 = vpack.c.bf16 %v239_v0, %v238_v13 }
  0xd3   :  { %582 = vmatprep.subr.bf16.mxu1 %v247_v6  ;;  %v3681_v48 = vunpack.i.h.bf16 %v2506_v49  ;;  %v3682_v19 = vunpack.i.l.bf16 %v2519_v2  ;;  %v3683_v44 = vunpack.i.h.bf16 %v2519_v2  ;;  %v3684_v47 = vunpack.i.l.bf16 %v2531_v60 }
  0xd4   :  { %625 = vmatprep.subr.bf16.mxu0 %v249_v61  ;;  %583 = vmatpush1.bf16.msra.mxu1 %v246_v63  ;;  %v1847_v5 = vpop.permute.xlu1 %1846  ;;  %v295_v27 = vsel %vm292_vm5, %v1833_v46, %v1838_v38  ;;  %v296_v51 = vsel %vm292_vm5, %v1834_v41, %v1839_v9  ;;  %v297_v10 = vsel %vm292_vm5, %v1718_v58, %v1833_v46  ;;  %v3685_v61 = vunpack.i.h.bf16 %v2531_v60 }
  0xd5   :  { %626 = vmatpush1.bf16.msra.mxu0 %v248_v42  ;;  %v1842_v17 = vpop.permute.xlu0 %1841  ;;  %584 = vmatprep.subr.bf16.mxu1 %v259_v21  ;;  %v1849_v53 = vunpack.i.h.bf16 %v1847_v5  ;;  %v1848_v33 = vunpack.i.l.bf16 %v1847_v5  ;;  %v308_v32 = vpack.c.bf16 %v296_v51, %v295_v27  ;;  %v298_v23 = vsel %vm292_vm5, %v1719_v55, %v1834_v41 }
  0xd6   :  { %v1844_v3 = vunpack.i.h.bf16 %v1842_v17  ;;  %v1843_v24 = vunpack.i.l.bf16 %v1842_v17  ;;  %627 = vmatprep.subr.bf16.mxu0 %v261_v45  ;;  %v307_v29 = vpack.c.bf16 %v298_v23, %v297_v10 }
  0xd7   :  { %v346_v62 = vsel %vm341_vm6, %v3682_v19, %v1848_v33  ;;  %v347_v40 = vsel %vm341_vm6, %v3683_v44, %v1849_v53  ;;  %v45_v44 = vld [vmem:[%s3645_s7] sm:$0x3f] }
  0xd8   :  { %v294_v14 = vsel %vm292_vm5, %v1839_v9, %v1844_v3  ;;  %v293_v15 = vsel %vm292_vm5, %v1838_v38, %v1843_v24  ;;  %585 = vmatpush1.bf16.msra.mxu1 %v258_v22  ;;  %v1857_v21 = vpop.permute.xlu1 %1856  ;;  %v303_v58 = vsel %vm292_vm5, %v1843_v24, %v1723_v31  ;;  %v304_v55 = vsel %vm292_vm5, %v1844_v3, %v3678_v50 }
  0xd9   :  { %v309_v25 = vpack.c.bf16 %v294_v14, %v293_v15  ;;  %628 = vmatpush1.bf16.msra.mxu0 %v3679_v57  ;;  %v1859_v28 = vunpack.i.h.bf16 %v1857_v21  ;;  %v1858_v52 = vunpack.i.l.bf16 %v1857_v21  ;;  %v1852_v11 = vpop.permute.xlu0 %1851  ;;  %586 = vmatprep.subr.bf16.mxu1 %v308_v32  ;;  %v310_v12 = vpack.c.bf16 %v304_v55, %v303_v58 }
  0xda   :  { %v1854_v22 = vunpack.i.h.bf16 %v1852_v11  ;;  %v1853_v56 = vunpack.i.l.bf16 %v1852_v11  ;;  %v3680_v31 = vunpack.i.l.bf16 %v2506_v49  ;;  %v356_v4 = vpack.c.bf16 %v347_v40, %v346_v62 }
  0xdb   :  { %629 = vmatprep.subr.bf16.mxu0 %v310_v12  ;;  %v353_v18 = vsel %vm341_vm6, %v1859_v28, %v3681_v48  ;;  %v3687_v32 = vunpack.i.h.bf16 %v2552_v54  ;;  %v3688_v57 = vunpack.i.l.bf16 %v2572_v59  ;;  %v3690_v12 = vunpack.i.h.bf16 %v2581_v35 }
  0xdc   :  { %v352_v20 = vsel %vm341_vm6, %v1858_v52, %v3680_v31  ;;  %v343_v43 = vsel %vm341_vm6, %v1854_v22, %v1859_v28  ;;  %v342_v34 = vsel %vm341_vm6, %v1853_v56, %v1858_v52  ;;  %587 = vmatpush1.bf16.msra.mxu1 %v307_v29  ;;  %v1867_v49 = vpop.permute.xlu1 %1866  ;;  %v344_v45 = vsel %vm341_vm6, %v1848_v33, %v1853_v56 }
  0xdd   :  { %v345_v16 = vsel %vm341_vm6, %v1849_v53, %v1854_v22  ;;  %v358_v7 = vpack.c.bf16 %v343_v43, %v342_v34  ;;  %630 = vmatpush1.bf16.msra.mxu0 %v309_v25  ;;  %v1869_v2 = vunpack.i.h.bf16 %v1867_v49  ;;  %v1868_v13 = vunpack.i.l.bf16 %v1867_v49  ;;  %v1862_v0 = vpop.permute.xlu0 %1861 }
  0xde   :  { %v357_v1 = vpack.c.bf16 %v345_v16, %v344_v45  ;;  %v1864_v37 = vunpack.i.h.bf16 %v1862_v0  ;;  %v1863_v30 = vunpack.i.l.bf16 %v1862_v0  ;;  %v359_v36 = vpack.c.bf16 %v353_v18, %v352_v20 }
  0xdf   :  { %v3686_v33 = vunpack.i.l.bf16 %v2552_v54  ;;  %v3689_v52 = vunpack.i.l.bf16 %v2581_v35  ;;  %v3691_v18 = vlaneseq }
  0xe0   :  { %588 = vmatprep.subr.bf16.mxu1 %v357_v1  ;;  %631 = vmatprep.subr.bf16.mxu0 %v359_v36  ;;  %v1877_v42 = vpop.permute.xlu1 %1876  ;;  %v393_v9 = vsel %vm390_vm7, %v1863_v30, %v1868_v13  ;;  %v394_v38 = vsel %vm390_vm7, %v1864_v37, %v1869_v2  ;;  %v395_v6 = vsel %vm390_vm7, %v3684_v47, %v1863_v30 }
  0xe1   :  { %589 = vmatpush1.bf16.msra.mxu1 %v356_v4  ;;  %632 = vmatpush1.bf16.msra.mxu0 %v358_v7  ;;  %v1872_v41 = vpop.permute.xlu0 %1871  ;;  %v406_v46 = vpack.c.bf16 %v394_v38, %v393_v9  ;;  %v396_v63 = vsel %vm390_vm7, %v3685_v61, %v1864_v37  ;;  %v1879_v17 = vunpack.i.h.bf16 %v1877_v42  ;;  %v1878_v3 = vunpack.i.l.bf16 %v1877_v42 }
  0xe2   :  { %v1874_v5 = vunpack.i.h.bf16 %v1872_v41  ;;  %v1873_v27 = vunpack.i.l.bf16 %v1872_v41  ;;  %v405_v51 = vpack.c.bf16 %v396_v63, %v395_v6  ;;  %v668_v19 = vshrl.u32 %v3691_v18, 7 }
  0xe3   :  { %590 = vmatprep.subr.bf16.mxu1 %v406_v46  ;;  %v444_v11 = vsel %vm439_vm8, %v3689_v52, %v1878_v3  ;;  %v445_v22 = vsel %vm439_vm8, %v3690_v12, %v1879_v17 }
  0xe4   :  { %v392_v24 = vsel %vm390_vm7, %v1869_v2, %v1874_v5  ;;  %v391_v10 = vsel %vm390_vm7, %v1868_v13, %v1873_v27  ;;  %v1887_v53 = vpop.permute.xlu1 %1886  ;;  %v401_v60 = vsel %vm390_vm7, %v1873_v27, %v3686_v33  ;;  %v402_v23 = vsel %vm390_vm7, %v1874_v5, %v3687_v32 }
  0xe5   :  { %591 = vmatpush1.bf16.msra.mxu1 %v405_v51  ;;  %v407_v14 = vpack.c.bf16 %v392_v24, %v391_v10  ;;  %v1889_v15 = vunpack.i.h.bf16 %v1887_v53  ;;  %v1888_v21 = vunpack.i.l.bf16 %v1887_v53  ;;  %v1882_v58 = vpop.permute.xlu0 %1881  ;;  %v408_v50 = vpack.c.bf16 %v402_v23, %v401_v60 }
  0xe6   :  { %v1884_v55 = vunpack.i.h.bf16 %v1882_v58  ;;  %v1883_v25 = vunpack.i.l.bf16 %v1882_v58  ;;  %v454_v35 = vpack.c.bf16 %v445_v22, %v444_v11  ;;  %v669_v62 = vsub.s32 0, %v668_v19 }
  0xe7   :  { %633 = vmatprep.subr.bf16.mxu0 %v408_v50  ;;  %v450_v28 = vsel %vm439_vm8, %v1888_v21, %v3688_v57  ;;  %v451_v54 = vsel %vm439_vm8, %v1889_v15, %v1779_v8  ;;  %v673_v40 = vsub.s32 1, %v668_v19  ;;  %v677_v30 = vsub.s32 2, %v668_v19 }
  0xe8   :  { %v441_v56 = vsel %vm439_vm8, %v1884_v55, %v1889_v15  ;;  %v440_v29 = vsel %vm439_vm8, %v1883_v25, %v1888_v21  ;;  %634 = vmatpush1.bf16.msra.mxu0 %v407_v14  ;;  %v442_v59 = vsel %vm439_vm8, %v1878_v3, %v1883_v25  ;;  %v443_v8 = vsel %vm439_vm8, %v1879_v17, %v1884_v55 }
  0xe9   :  { %v456_v31 = vpack.c.bf16 %v441_v56, %v440_v29  ;;  %v455_v20 = vpack.c.bf16 %v443_v8, %v442_v59  ;;  %v457_v48 = vpack.c.bf16 %v451_v54, %v450_v28  ;;  %v2806_v43 = vrot.slane %v45_v44, %v669_v62 }
  0xea   :  { %v2808_v34 = vrot.slane %v45_v44, %v673_v40  ;;  %v681_v36 = vsub.s32 3, %v668_v19  ;;  %v685_v4 = vsub.s32 4, %v668_v19  ;;  %v2826_v42 = vrot.slane %v45_v44, %v677_v30 }
  0xeb   :  { %592 = vmatprep.subr.bf16.mxu1 %v455_v20  ;;  %635 = vmatprep.subr.bf16.mxu0 %v457_v48  ;;  %v689_v47 = vsub.s32 5, %v668_v19 }
  0xec   :  { %593 = vmatpush1.bf16.msra.mxu1 %v454_v35  ;;  %636 = vmatpush1.bf16.msra.mxu0 %v456_v31  ;;  %v2828_v9 = vrot.slane %v45_v44, %v681_v36  ;;  %v2830_v38 = vrot.slane %v45_v44, %v685_v4 }
  0xed   :  { %v2856_v33 = vrot.slane %v45_v44, %v689_v47 }
  0xef   :  { %609 = vmatmul.mubr.bf16.vlgmr.msra.gmra.mrb[0].mxu1 %v2604_v39  ;;  %652 = vmatmul.mubr.bf16.vlgmr.msra.gmra.mrb[4].mxu0 %v2604_v39 }
 0x196   :  { %v2810_v49 = vpop.f32.mrb[0].mxu0 }
 0x197   :  { %v697_v45 = vmul.f32 %v2806_v43, %v2810_v49  ;;  %v2814_v16 = vpop.f32.mrb[1].mxu0 }
 0x198   :  { %v698_v39 = vmul.f32 %v2808_v34, %v2814_v16  ;;  %v2818_v7 = vpop.f32.mrb[2].mxu0 }
 0x199   :  { %v703_v2 = vmul.f32 %v2806_v43, %v2818_v7  ;;  %v2822_v13 = vpop.f32.mrb[3].mxu0 }
 0x19a   :  { %v709_v0 = vadd.f32 %v698_v39, %v697_v45  ;;  %v704_v1 = vmul.f32 %v2808_v34, %v2822_v13 }
 0x19c   :  { %v716_v37 = vadd.f32 %v704_v1, %v703_v2 }
 0x1c2   :  { %v2832_v6 = vpop.f32.mrb[0].mxu1  ;;  %v2834_v41 = vpop.f32.mrb[4].mxu0 }
 0x1c3   :  { %v699_v46 = vmul.f32 %v2826_v42, %v2832_v6  ;;  %v2838_v61 = vpop.f32.mrb[1].mxu1  ;;  %v2840_v63 = vpop.f32.mrb[5].mxu0  ;;  %v701_v3 = vmul.f32 %v2830_v38, %v2834_v41 }
 0x1c4   :  { %v700_v5 = vmul.f32 %v2828_v9, %v2838_v61  ;;  %v2844_v27 = vpop.f32.mrb[2].mxu1  ;;  %v2846_v51 = vpop.f32.mrb[6].mxu0  ;;  %v702_v15 = vmul.f32 %v2856_v33, %v2840_v63 }
 0x1c5   :  { %v710_v17 = vadd.f32 %v709_v0, %v699_v46  ;;  %v705_v24 = vmul.f32 %v2826_v42, %v2844_v27  ;;  %v2852_v10 = vpop.f32.mrb[3].mxu1  ;;  %v2854_v53 = vpop.f32.mrb[7].mxu0  ;;  %v707_v14 = vmul.f32 %v2830_v38, %v2846_v51 }
 0x1c6   :  { %v706_v60 = vmul.f32 %v2828_v9, %v2852_v10  ;;  %v708_v55 = vmul.f32 %v2856_v33, %v2854_v53 }
 0x1c7   :  { %v717_v32 = vadd.f32 %v716_v37, %v705_v24  ;;  %v711_v23 = vadd.f32 %v710_v17, %v700_v5 }
 0x1c9   :  { %v712_v21 = vadd.f32 %v711_v23, %v701_v3  ;;  %v718_v58 = vadd.f32 %v717_v32, %v706_v60 }
 0x1cb   :  { %v713_v50 = vadd.f32 %v712_v21, %v702_v15  ;;  %v719_v25 = vadd.f32 %v718_v58, %v707_v14 }
 0x1cd   :  { %714 = vadd.xlane.f32.xlu0 %v713_v50  ;;  %v720_v57 = vadd.f32 %v719_v25, %v708_v55 }
 0x1cf   :  { %721 = vadd.xlane.f32.xlu1 %v720_v57 }
 0x25a   :  { %v715_v28 = vpop.xlane.xlu0 %714 }
 0x25b   :  { %v2866_v54 = vmul.f32 0.001953125, %v715_v28 }
 0x25c   :  { %v722_v52 = vpop.xlane.xlu1 %721 }
 0x25d   :  { %v2868_v11 = vmul.f32 0.001953125, %v722_v52  ;;  %v725_v12 = vsub.f32 %v2810_v49, %v2866_v54  ;;  %v726_v22 = vsub.f32 %v2814_v16, %v2866_v54  ;;  %v727_v56 = vsub.f32 %v2832_v6, %v2866_v54 }
 0x25e   :  { %v728_v29 = vsub.f32 %v2838_v61, %v2866_v54  ;;  %v729_v59 = vsub.f32 %v2834_v41, %v2866_v54  ;;  %v730_v35 = vsub.f32 %v2840_v63, %v2866_v54 }
 0x25f   :  { %v737_v8 = vmul.f32 %v725_v12, %v2806_v43  ;;  %v738_v31 = vmul.f32 %v726_v22, %v2808_v34  ;;  %v739_v20 = vmul.f32 %v727_v56, %v2826_v42  ;;  %v731_v48 = vsub.f32 %v2818_v7, %v2868_v11 }
 0x260   :  { %v732_v18 = vsub.f32 %v2822_v13, %v2868_v11  ;;  %v740_v19 = vmul.f32 %v728_v29, %v2828_v9  ;;  %v733_v40 = vsub.f32 %v2844_v27, %v2868_v11  ;;  %v734_v45 = vsub.f32 %v2852_v10, %v2868_v11 }
 0x261   :  { %v749_v62 = vmul.f32 %v737_v8, %v737_v8  ;;  %v750_v44 = vmul.f32 %v738_v31, %v738_v31  ;;  %v741_v39 = vmul.f32 %v729_v59, %v2830_v38  ;;  %v751_v2 = vmul.f32 %v739_v20, %v739_v20 }
 0x262   :  { %v743_v1 = vmul.f32 %v731_v48, %v2806_v43  ;;  %v735_v37 = vsub.f32 %v2846_v51, %v2868_v11  ;;  %v744_v30 = vmul.f32 %v732_v18, %v2808_v34  ;;  %v745_v36 = vmul.f32 %v733_v40, %v2826_v42  ;;  %v662_v18 = vld [vmem:[%s3640_s2] sm:$0xff] }
 0x263   :  { %v761_v0 = vadd.f32 %v750_v44, %v749_v62  ;;  %v742_v4 = vmul.f32 %v730_v35, %v2856_v33  ;;  %v752_v47 = vmul.f32 %v740_v19, %v740_v19  ;;  %v736_v17 = vsub.f32 %v2854_v53, %v2868_v11  ;;  %v664_v44 = vld [vmem:[%s3641_s3] sm:$0xff] }
 0x264   :  { %v755_v5 = vmul.f32 %v743_v1, %v743_v1  ;;  %v746_v3 = vmul.f32 %v734_v45, %v2828_v9  ;;  %v756_v24 = vmul.f32 %v744_v30, %v744_v30  ;;  %v753_v60 = vmul.f32 %v741_v39, %v741_v39  ;;  %v663_v45 = vld [vmem:[%s3640_s2 + $0x8] sm:$0xff] }
 0x265   :  { %v762_v46 = vadd.f32 %v761_v0, %v751_v2  ;;  %v747_v23 = vmul.f32 %v735_v37, %v2830_v38  ;;  %v757_v14 = vmul.f32 %v745_v36, %v745_v36  ;;  %v754_v21 = vmul.f32 %v742_v4, %v742_v4  ;;  %v665_v1 = vld [vmem:[%s3641_s3 + $0x8] sm:$0xff] }
 0x266   :  { %v768_v15 = vadd.f32 %v756_v24, %v755_v5  ;;  %v748_v50 = vmul.f32 %v736_v17, %v2856_v33  ;;  %v758_v55 = vmul.f32 %v746_v3, %v746_v3  ;;  %v2205_v29 = vmov 0  }
 0x267   :  { %v763_v32 = vadd.f32 %v762_v46, %v752_v47  ;;  %v759_v28 = vmul.f32 %v747_v23, %v747_v23  ;;  %1890 = vset.pattern.permute.xlu1 %v2205_v29  ;;  %1891 = vset.pattern.permute.xlu0 %v2205_v29 }
 0x268   :  { %v769_v25 = vadd.f32 %v768_v15, %v757_v14  ;;  %v760_v12 = vmul.f32 %v748_v50, %v748_v50 }
 0x269   :  { %v764_v58 = vadd.f32 %v763_v32, %v753_v60 }
 0x26a   :  { %v770_v52 = vadd.f32 %v769_v25, %v758_v55 }
 0x26b   :  { %v765_v57 = vadd.f32 %v764_v58, %v754_v21 }
 0x26c   :  { %v771_v22 = vadd.f32 %v770_v52, %v759_v28 }
 0x26d   :  { %766 = vadd.xlane.f32.xlu0 %v765_v57 }
 0x26e   :  { %v772_v56 = vadd.f32 %v771_v22, %v760_v12 }
 0x271   :  { %773 = vadd.xlane.f32.xlu0 %v772_v56 }
 0x2fa   :  { %v767_v59 = vpop.xlane.xlu0 %766 }
 0x2fb   :  { %v775_v8 = vmul.f32 0.001953125, %v767_v59 }
 0x2fd   :  { %v777_v31 = vadd.f32 1e-05, %v775_v8 }
 0x2fe   :  { %v774_v20 = vpop.xlane.xlu0 %773 }
 0x2ff   :  { %2138 = vrsqrt.f32 %v777_v31  ;;  %v776_v48 = vmul.f32 0.001953125, %v774_v20 }
 0x301   :  { %v778_v35 = vadd.f32 1e-05, %v776_v48 }
 0x303   :  { %2140 = vrsqrt.f32 %v778_v35 }
 0x309   :  { %v2139_v19 = vpop.eup %2138 }
 0x30a   :  { %v781_v62 = vmul.f32 %v2139_v19, %v662_v18 }
 0x30c   :  { %789 = vperm.xlu1 %1890, %v781_v62   ;;  %v783_v40 = vmul.f32 %v781_v62, %v2866_v54 }
 0x30d   :  { %v2141_v39 = vpop.eup %2140 }
 0x30e   :  { %v785_v2 = vsub.f32 %v664_v44, %v783_v40  ;;  %v782_v0 = vmul.f32 %v2141_v39, %v663_v45 }
 0x310   :  { %811 = vperm.xlu1 %1890, %v785_v2   ;;  %794 = vperm.xlu0 %1891, %v782_v0   ;;  %v784_v37 = vmul.f32 %v782_v0, %v2868_v11 }
 0x312   :  { %v786_v30 = vsub.f32 %v665_v1, %v784_v37 }
 0x314   :  { %816 = vperm.xlu1 %1890, %v786_v30  }
 0x38b   :  { %v790_v36 = vpop.permute.xlu1 %789 }
 0x38c   :  { %v797_v54 = vmul.f32 %v790_v36, %v2810_v49  ;;  %v798_v4 = vmul.f32 %v790_v36, %v2814_v16  ;;  %v799_v47 = vmul.f32 %v790_v36, %v2832_v6  ;;  %v800_v46 = vmul.f32 %v790_v36, %v2838_v61 }
 0x38d   :  { %v801_v5 = vmul.f32 %v790_v36, %v2834_v41  ;;  %v802_v17 = vmul.f32 %v790_v36, %v2840_v63 }
 0x38f   :  { %v812_v3 = vpop.permute.xlu1 %811  ;;  %v795_v23 = vpop.permute.xlu0 %794 }
 0x390   :  { %v819_v24 = vadd.f32 %v812_v3, %v797_v54  ;;  %v820_v60 = vadd.f32 %v812_v3, %v798_v4  ;;  %v821_v32 = vadd.f32 %v812_v3, %v799_v47  ;;  %v822_v11 = vadd.f32 %v812_v3, %v800_v46 }
 0x391   :  { %v823_v14 = vadd.f32 %v812_v3, %v801_v5  ;;  %v824_v15 = vadd.f32 %v812_v3, %v802_v17  ;;  %v803_v16 = vmul.f32 %v795_v23, %v2818_v7  ;;  %v804_v6 = vmul.f32 %v795_v23, %v2822_v13  ;;  %v3025_v3 = vld [vmem:[%s3642_s4 + $0x4] ss:$8 sps:$4 sm:$0xff]  }
 0x392   :  { %v831_v21 = vmax.f32 %v819_v24, 0.0  ;;  %v832_v49 = vmax.f32 %v820_v60, 0.0  ;;  %v833_v58 = vmax.f32 %v821_v32, 0.0  ;;  %v834_v61 = vmax.f32 %v822_v11, 0.0  ;;  %1634 = vmatprep.mubr.msk.bf16.mxu1 %vm529_vm0, %v3025_v3  ;;  %1635 = vmatprep.mubr.msk.bf16.mxu0 %vm529_vm0, %v3025_v3 }
 0x393   :  { %v805_v41 = vmul.f32 %v795_v23, %v2844_v27  ;;  %v806_v63 = vmul.f32 %v795_v23, %v2852_v10  ;;  %v817_v50 = vpop.permute.xlu1 %816  ;;  %v835_v55 = vmax.f32 %v823_v14, 0.0  ;;  %v836_v25 = vmax.f32 %v824_v15, 0.0 }
 0x394   :  { %v807_v57 = vmul.f32 %v795_v23, %v2846_v51  ;;  %v808_v28 = vmul.f32 %v795_v23, %v2854_v53  ;;  %v825_v52 = vadd.f32 %v817_v50, %v803_v16  ;;  %v826_v12 = vadd.f32 %v817_v50, %v804_v6 }
 0x395   :  { %v827_v22 = vadd.f32 %v817_v50, %v805_v41  ;;  %v828_v56 = vadd.f32 %v817_v50, %v806_v63  ;;  %v2933_v7 = vmul.f32 %v831_v21, %v2806_v43  ;;  %v2936_v13 = vmul.f32 %v832_v49, %v2808_v34 }
 0x396   :  { %v829_v27 = vadd.f32 %v817_v50, %v807_v57  ;;  %v830_v29 = vadd.f32 %v817_v50, %v808_v28  ;;  %v837_v10 = vmax.f32 %v825_v52, 0.0  ;;  %v838_v59 = vmax.f32 %v826_v12, 0.0 }
 0x397   :  { %v839_v8 = vmax.f32 %v827_v22, 0.0  ;;  %v840_v31 = vmax.f32 %v828_v56, 0.0  ;;  %v2939_v51 = vmul.f32 %v833_v58, %v2826_v42  ;;  %v2942_v53 = vmul.f32 %v834_v61, %v2828_v9 }
 0x398   :  { %v841_v20 = vmax.f32 %v829_v27, 0.0  ;;  %v842_v48 = vmax.f32 %v830_v29, 0.0  ;;  %v2945_v35 = vmul.f32 %v835_v55, %v2830_v38  ;;  %v2948_v18 = vmul.f32 %v837_v10, %v2806_v43 }
 0x399   :  { %v2951_v19 = vmul.f32 %v838_v59, %v2808_v34  ;;  %v2954_v62 = vmul.f32 %v839_v8, %v2826_v42  ;;  %v2957_v44 = vmul.f32 %v836_v25, %v2856_v33  ;;  %v2960_v40 = vmul.f32 %v840_v31, %v2828_v9 }
 0x39a   :  { %v2963_v45 = vmul.f32 %v841_v20, %v2830_v38  ;;  %v2966_v39 = vmul.f32 %v842_v48, %v2856_v33  ;;  %v1922_v2 = vpack.i.bf16 %v2948_v18, %v2933_v7  ;;  %v1047_v4 = vpack.c.bf16 %v2948_v18, %v2933_v7 }
 0x39b   :  { %v1897_v0 = vpack.i.bf16 %v2951_v19, %v2936_v13  ;;  %v1972_v37 = vpack.i.bf16 %v2954_v62, %v2939_v51  ;;  %v2002_v30 = vpack.i.bf16 %v2960_v40, %v2942_v53  ;;  %v1048_v54 = vpack.c.bf16 %v2951_v19, %v2936_v13 }
 0x39c   :  { %v1932_v1 = vpack.i.bf16 %v2966_v39, %v2957_v44  ;;  %1923 = vrot.lane.b32.xlu0 %v1922_v2, %s2199_s20  ;;  %1893 = vrot.lane.b32.xlu1 %v1922_v2, %s2197_s0  ;;  %v2022_v36 = vpack.i.bf16 %v2963_v45, %v2945_v35 }
 0x3a0   :  { %1933 = vrot.lane.b32.xlu0 %v1932_v1, %s2199_s20  ;;  %1898 = vrot.lane.b32.xlu1 %v1897_v0, %s2197_s0 }
 0x3a4   :  { %1943 = vrot.lane.b32.xlu0 %v1897_v0, %s2200_s21  ;;  %1903 = vrot.lane.b32.xlu1 %v1932_v1, %s2197_s0 }
 0x3a8   :  { %1953 = vrot.lane.b32.xlu0 %v1897_v0, %s2201_s22  ;;  %1908 = vrot.lane.b32.xlu1 %v1922_v2, %s2198_s19 }
 0x3ac   :  { %1963 = vrot.lane.b32.xlu0 %v1922_v2, %s2201_s22  ;;  %1913 = vrot.lane.b32.xlu1 %v1897_v0, %s2198_s19 }
 0x3b0   :  { %1973 = vrot.lane.b32.xlu0 %v1972_v37, %s2202_s23  ;;  %1918 = vrot.lane.b32.xlu1 %v1932_v1, %s2198_s19 }
 0x3b4   :  { %1983 = vrot.lane.b32.xlu0 %v1897_v0, %s2203_s24  ;;  %1928 = vrot.lane.b32.xlu1 %v1897_v0, %s2199_s20 }
 0x3b8   :  { %1993 = vrot.lane.b32.xlu0 %v1922_v2, %s2203_s24  ;;  %1938 = vrot.lane.b32.xlu1 %v1922_v2, %s2200_s21 }
 0x3bc   :  { %2003 = vrot.lane.b32.xlu0 %v2002_v30, %s2197_s0  ;;  %1948 = vrot.lane.b32.xlu1 %v1932_v1, %s2200_s21 }
 0x3c0   :  { %2013 = vrot.lane.b32.xlu0 %v1972_v37, %s2204_s27  ;;  %1958 = vrot.lane.b32.xlu1 %v1972_v37, %s2201_s22 }
 0x3c4   :  { %2023 = vrot.lane.b32.xlu0 %v2022_v36, %s2197_s0  ;;  %1968 = vrot.lane.b32.xlu1 %v1897_v0, %s2202_s23 }
 0x3c8   :  { %2033 = vrot.lane.b32.xlu0 %v2002_v30, %s2198_s19  ;;  %1978 = vrot.lane.b32.xlu1 %v1922_v2, %s2202_s23 }
 0x3cc   :  { %2043 = vrot.lane.b32.xlu0 %v1972_v37, %s2199_s20  ;;  %1988 = vrot.lane.b32.xlu1 %v1972_v37, %s2203_s24 }
 0x3d0   :  { %2053 = vrot.lane.b32.xlu0 %v2022_v36, %s2199_s20  ;;  %1998 = vrot.lane.b32.xlu1 %v1972_v37, %s2197_s0 }
 0x3d4   :  { %2063 = vrot.lane.b32.xlu0 %v2002_v30, %s2200_s21  ;;  %2008 = vrot.lane.b32.xlu1 %v1897_v0, %s2204_s27 }
 0x3d8   :  { %2073 = vrot.lane.b32.xlu0 %v2002_v30, %s2201_s22  ;;  %2018 = vrot.lane.b32.xlu1 %v1922_v2, %s2204_s27 }
 0x3dc   :  { %2083 = vrot.lane.b32.xlu0 %v1932_v1, %s2201_s22  ;;  %2028 = vrot.lane.b32.xlu1 %v1972_v37, %s2198_s19 }
 0x3e0   :  { %2093 = vrot.lane.b32.xlu0 %v2022_v36, %s2202_s23  ;;  %2038 = vrot.lane.b32.xlu1 %v2022_v36, %s2198_s19 }
 0x3e4   :  { %2103 = vrot.lane.b32.xlu0 %v2002_v30, %s2203_s24  ;;  %2048 = vrot.lane.b32.xlu1 %v2002_v30, %s2199_s20 }
 0x3e8   :  { %2113 = vrot.lane.b32.xlu0 %v1932_v1, %s2203_s24  ;;  %2058 = vrot.lane.b32.xlu1 %v1972_v37, %s2200_s21 }
 0x3ec   :  { %2123 = vrot.lane.b32.xlu0 %v2022_v36, %s2204_s27  ;;  %2068 = vrot.lane.b32.xlu1 %v2022_v36, %s2200_s21 }
 0x3f0   :  { %2078 = vrot.lane.b32.xlu1 %v2022_v36, %s2201_s22 }
 0x3f4   :  { %2088 = vrot.lane.b32.xlu1 %v2002_v30, %s2202_s23 }
 0x3f8   :  { %2098 = vrot.lane.b32.xlu1 %v1932_v1, %s2202_s23 }
 0x3fc   :  { %2108 = vrot.lane.b32.xlu1 %v2022_v36, %s2203_s24 }
 0x400   :  { %2118 = vrot.lane.b32.xlu1 %v2002_v30, %s2204_s27 }
 0x404   :  { %2128 = vrot.lane.b32.xlu1 %v1932_v1, %s2204_s27 }
 0x40e   :  { %v1924_v24 = vpop.permute.xlu0 %1923  ;;  %v1894_v60 = vpop.permute.xlu1 %1893 }
 0x40f   :  { %v1896_v23 = vunpack.i.h.bf16 %v1894_v60  ;;  %v1895_v14 = vunpack.i.l.bf16 %v1894_v60  ;;  %v1926_v37 = vunpack.i.h.bf16 %v1924_v24  ;;  %v1925_v30 = vunpack.i.l.bf16 %v1924_v24 }
 0x412   :  { %v3049_v32 = vpop.permute.xlu0 %1933  ;;  %v3051_v11 = vpop.permute.xlu1 %1898 }
 0x413   :  { %v1901_v15 = vunpack.i.h.bf16 %v3051_v11  ;;  %v1900_v21 = vunpack.i.l.bf16 %v3051_v11  ;;  %v1936_v48 = vunpack.i.h.bf16 %v3049_v32  ;;  %v1935_v2 = vunpack.i.l.bf16 %v3049_v32 }
 0x415   :  { %v887_v49 = vsel %vm84_vm1, %v1895_v14, %v1900_v21  ;;  %v888_v16 = vsel %vm84_vm1, %v1896_v23, %v1901_v15  ;;  %v985_v24 = vsel %vm182_vm3, %v1935_v2, %v1925_v30 }
 0x416   :  { %v3063_v6 = vpop.permute.xlu0 %1943  ;;  %v3065_v58 = vpop.permute.xlu1 %1903  ;;  %v892_v61 = vpack.c.bf16 %v888_v16, %v887_v49  ;;  %v986_v16 = vsel %vm182_vm3, %v1936_v48, %v1926_v37 }
 0x417   :  { %v1906_v41 = vunpack.i.h.bf16 %v3065_v58  ;;  %v1905_v63 = vunpack.i.l.bf16 %v3065_v58 }
 0x418   :  { %1319 = vmatprep.subr.bf16.mxu1 %v892_v61 }
 0x419   :  { %v889_v50 = vsel %vm84_vm1, %v1905_v63, %v1895_v14  ;;  %v890_v55 = vsel %vm84_vm1, %v1906_v41, %v1896_v23 }
 0x41a   :  { %v891_v25 = vpack.c.bf16 %v890_v55, %v889_v50  ;;  %v3077_v57 = vpop.permute.xlu0 %1953  ;;  %v1909_v28 = vpop.permute.xlu1 %1908 }
 0x41b   :  { %v1911_v22 = vunpack.i.h.bf16 %v1909_v28  ;;  %v1910_v56 = vunpack.i.l.bf16 %v1909_v28  ;;  %v987_v28 = vpack.c.bf16 %v986_v16, %v985_v24  ;;  %v1955_v5 = vunpack.i.l.bf16 %v3077_v57 }
 0x41c   :  { %1320 = vmatpush1.bf16.msra.mxu1 %v891_v25 }
 0x41e   :  { %v3079_v52 = vpop.permute.xlu0 %1963  ;;  %v3081_v12 = vpop.permute.xlu1 %1913 }
 0x41f   :  { %v1916_v27 = vunpack.i.h.bf16 %v3081_v12  ;;  %v1915_v29 = vunpack.i.l.bf16 %v3081_v12  ;;  %v3665_v17 = vunpack.i.l.bf16 %v3079_v52 }
 0x421   :  { %v935_v10 = vsel %vm133_vm2, %v1910_v56, %v1915_v29  ;;  %v936_v59 = vsel %vm133_vm2, %v1911_v22, %v1916_v27 }
 0x422   :  { %v3093_v8 = vpop.permute.xlu0 %1973  ;;  %v3095_v31 = vpop.permute.xlu1 %1918  ;;  %v940_v20 = vpack.c.bf16 %v936_v59, %v935_v10  ;;  %v1946_v59 = vunpack.i.h.bf16 %v3063_v6 }
 0x423   :  { %v1921_v0 = vunpack.i.h.bf16 %v3095_v31  ;;  %v1920_v1 = vunpack.i.l.bf16 %v3095_v31 }
 0x424   :  { %1321 = vmatprep.subr.bf16.mxu1 %v940_v20  ;;  %v3672_v20 = vunpack.i.l.bf16 %v3063_v6 }
 0x425   :  { %v937_v36 = vsel %vm133_vm2, %v1920_v1, %v1910_v56  ;;  %v938_v60 = vsel %vm133_vm2, %v1921_v0, %v1911_v22 }
 0x426   :  { %v939_v23 = vpack.c.bf16 %v938_v60, %v937_v36  ;;  %v3109_v14 = vpop.permute.xlu0 %1983  ;;  %v3111_v49 = vpop.permute.xlu1 %1928 }
 0x427   :  { %v1931_v61 = vunpack.i.h.bf16 %v3111_v49  ;;  %v1930_v50 = vunpack.i.l.bf16 %v3111_v49 }
 0x428   :  { %1322 = vmatpush1.bf16.msra.mxu1 %v939_v23 }
 0x429   :  { %v983_v55 = vsel %vm182_vm3, %v1925_v30, %v1930_v50  ;;  %v984_v25 = vsel %vm182_vm3, %v1926_v37, %v1931_v61 }
 0x42a   :  { %v3131_v22 = vpop.permute.xlu0 %1993  ;;  %v1939_v56 = vpop.permute.xlu1 %1938  ;;  %v988_v10 = vpack.c.bf16 %v984_v25, %v983_v55 }
 0x42b   :  { %v1941_v36 = vunpack.i.h.bf16 %v1939_v56  ;;  %v1940_v60 = vunpack.i.l.bf16 %v1939_v56  ;;  %v3669_v7 = vunpack.i.h.bf16 %v3131_v22  ;;  %v3670_v18 = vunpack.i.l.bf16 %v3131_v22 }
 0x42c   :  { %1323 = vmatprep.subr.bf16.mxu1 %v988_v10  ;;  %v3663_v10 = vunpack.i.h.bf16 %v3079_v52 }
 0x42d   :  { %1324 = vmatpush1.bf16.msra.mxu1 %v987_v28  ;;  %v1031_v30 = vsel %vm231_vm4, %v1940_v60, %v3672_v20  ;;  %v1032_v37 = vsel %vm231_vm4, %v1941_v36, %v1946_v59 }
 0x42e   :  { %v3143_v23 = vpop.permute.xlu0 %2003  ;;  %v3145_v24 = vpop.permute.xlu1 %1948  ;;  %v1036_v16 = vpack.c.bf16 %v1032_v37, %v1031_v30 }
 0x42f   :  { %v3661_v55 = vunpack.i.h.bf16 %v3145_v24  ;;  %v3671_v25 = vunpack.i.l.bf16 %v3145_v24 }
 0x430   :  { %1325 = vmatprep.subr.bf16.mxu1 %v1036_v16  ;;  %v1956_v16 = vunpack.i.h.bf16 %v3077_v57  ;;  %v1091_v57 = vsel %vm292_vm5, %v3665_v17, %v1955_v5  ;;  %v1985_v17 = vunpack.i.l.bf16 %v3109_v14 }
 0x431   :  { %v1033_v28 = vsel %vm231_vm4, %v3671_v25, %v1940_v60  ;;  %v1034_v56 = vsel %vm231_vm4, %v3661_v55, %v1941_v36  ;;  %v2005_v25 = vunpack.i.l.bf16 %v3143_v23 }
 0x432   :  { %v1035_v30 = vpack.c.bf16 %v1034_v56, %v1033_v28  ;;  %v3159_v37 = vpop.permute.xlu0 %2013  ;;  %v3161_v46 = vpop.permute.xlu1 %1958  ;;  %v1092_v13 = vsel %vm292_vm5, %v3663_v10, %v1956_v16 }
 0x433   :  { %v3662_v60 = vunpack.i.h.bf16 %v3161_v46  ;;  %v3660_v47 = vunpack.i.l.bf16 %v3161_v46 }
 0x434   :  { %1326 = vmatpush1.bf16.msra.mxu1 %v1035_v30  ;;  %v3666_v30 = vunpack.i.h.bf16 %v3093_v8 }
 0x435   :  { %1327 = vmatprep.subr.bf16.mxu1 %v1048_v54  ;;  %v1089_v36 = vsel %vm292_vm5, %v1955_v5, %v3660_v47  ;;  %v1090_v28 = vsel %vm292_vm5, %v1956_v16, %v3662_v60  ;;  %v3664_v47 = vunpack.i.l.bf16 %v3093_v8 }
 0x436   :  { %v3186_v19 = vpop.permute.xlu0 %2023  ;;  %v1969_v54 = vpop.permute.xlu1 %1968  ;;  %v1096_v56 = vpack.c.bf16 %v1090_v28, %v1089_v36  ;;  %v1095_v36 = vpack.c.bf16 %v1092_v13, %v1091_v57 }
 0x437   :  { %v1971_v55 = vunpack.i.h.bf16 %v1969_v54  ;;  %v1970_v60 = vunpack.i.l.bf16 %v1969_v54 }
 0x438   :  { %1328 = vmatpush1.bf16.msra.mxu1 %v1047_v4 }
 0x439   :  { %1329 = vmatprep.subr.bf16.mxu1 %v1096_v56  ;;  %v1137_v5 = vsel %vm341_vm6, %v1970_v60, %v3664_v47  ;;  %v1138_v16 = vsel %vm341_vm6, %v1971_v55, %v3666_v30  ;;  %v1986_v47 = vunpack.i.h.bf16 %v3109_v14  ;;  %v1187_v14 = vsel %vm390_vm7, %v3670_v18, %v1985_v17 }
 0x43a   :  { %v3201_v28 = vpop.permute.xlu0 %2033  ;;  %v3203_v10 = vpop.permute.xlu1 %1978  ;;  %v1144_v54 = vpack.c.bf16 %v1138_v16, %v1137_v5  ;;  %v2006_v18 = vunpack.i.h.bf16 %v3143_v23 }
 0x43b   :  { %v3667_v4 = vunpack.i.h.bf16 %v3203_v10  ;;  %v3668_v56 = vunpack.i.l.bf16 %v3203_v10 }
 0x43c   :  { %1330 = vmatpush1.bf16.msra.mxu1 %v1095_v36 }
 0x43d   :  { %v1139_v57 = vsel %vm341_vm6, %v3668_v56, %v1970_v60  ;;  %v1140_v13 = vsel %vm341_vm6, %v3667_v4, %v1971_v55  ;;  %1331 = vmatprep.subr.bf16.mxu1 %v1144_v54  ;;  %v1188_v60 = vsel %vm390_vm7, %v3669_v7, %v1986_v47 }
 0x43e   :  { %v1143_v5 = vpack.c.bf16 %v1140_v13, %v1139_v57  ;;  %v3219_v16 = vpop.permute.xlu0 %2043  ;;  %v3221_v30 = vpop.permute.xlu1 %1988  ;;  %v1191_v13 = vpack.c.bf16 %v1188_v60, %v1187_v14 }
 0x43f   :  { %v3673_v36 = vunpack.i.h.bf16 %v3221_v30  ;;  %v3676_v55 = vunpack.i.l.bf16 %v3221_v30  ;;  %v2046_v12 = vunpack.i.h.bf16 %v3219_v16 }
 0x440   :  { %1332 = vmatpush1.bf16.msra.mxu1 %v1143_v5 }
 0x441   :  { %v1185_v54 = vsel %vm390_vm7, %v1985_v17, %v3676_v55  ;;  %v1186_v57 = vsel %vm390_vm7, %v1986_v47, %v3673_v36  ;;  %v982_v31 = vsel %vm182_vm3, %v1931_v61, %v2046_v12 }
 0x442   :  { %v3241_v4 = vpop.permute.xlu0 %2053  ;;  %v1999_v56 = vpop.permute.xlu1 %1998  ;;  %v1192_v7 = vpack.c.bf16 %v1186_v57, %v1185_v54  ;;  %v3675_v54 = vunpack.i.h.bf16 %v3159_v37  ;;  %v3674_v57 = vunpack.i.l.bf16 %v3159_v37 }
 0x443   :  { %v2001_v5 = vunpack.i.h.bf16 %v1999_v56  ;;  %v2000_v20 = vunpack.i.l.bf16 %v1999_v56 }
 0x444   :  { %1333 = vmatprep.subr.bf16.mxu1 %v1192_v7 }
 0x445   :  { %v885_v17 = vsel %vm84_vm1, %v1900_v21, %v2000_v20  ;;  %v886_v47 = vsel %vm84_vm1, %v1901_v15, %v2001_v5  ;;  %1334 = vmatpush1.bf16.msra.mxu1 %v1191_v13  ;;  %v883_v14 = vsel %vm84_vm1, %v2000_v20, %v2005_v25  ;;  %v884_v23 = vsel %vm84_vm1, %v2001_v5, %v2006_v18 }
 0x446   :  { %v893_v60 = vpack.c.bf16 %v886_v47, %v885_v17  ;;  %v2009_v56 = vpop.permute.xlu1 %2008  ;;  %v894_v7 = vpack.c.bf16 %v884_v23, %v883_v14  ;;  %v3259_v21 = vpop.permute.xlu0 %2063  ;;  %v2026_v15 = vunpack.i.h.bf16 %v3186_v19  ;;  %v2025_v13 = vunpack.i.l.bf16 %v3186_v19 }
 0x447   :  { %v2011_v11 = vunpack.i.h.bf16 %v2009_v56  ;;  %v2010_v36 = vunpack.i.l.bf16 %v2009_v56  ;;  %v2066_v61 = vunpack.i.h.bf16 %v3259_v21 }
 0x448   :  { %1362 = vmatprep.subr.bf16.mxu0 %v894_v7  ;;  %v879_v19 = vsel %vm84_vm1, %v2025_v13, %v1905_v63  ;;  %v881_v63 = vsel %vm84_vm1, %v2005_v25, %v2025_v13  ;;  %v882_v58 = vsel %vm84_vm1, %v2006_v18, %v2026_v15  ;;  %v2055_v25 = vunpack.i.l.bf16 %v3241_v4 }
 0x449   :  { %1363 = vmatpush1.bf16.msra.mxu0 %v893_v60  ;;  %v1233_v20 = vsel %vm439_vm8, %v2010_v36, %v3674_v57  ;;  %v1234_v5 = vsel %vm439_vm8, %v2011_v11, %v3675_v54  ;;  %v880_v60 = vsel %vm84_vm1, %v2026_v15, %v1906_v41  ;;  %v2036_v41 = vunpack.i.h.bf16 %v3201_v28 }
 0x44a   :  { %v3271_v17 = vpop.permute.xlu1 %2018  ;;  %v1240_v47 = vpack.c.bf16 %v1234_v5, %v1233_v20  ;;  %v3283_v56 = vpop.permute.xlu0 %2073  ;;  %v2035_v57 = vunpack.i.l.bf16 %v3201_v28 }
 0x44b   :  { %v2021_v14 = vunpack.i.h.bf16 %v3271_v17  ;;  %v3677_v23 = vunpack.i.l.bf16 %v3271_v17 }
 0x44c   :  { %1335 = vmatprep.subr.bf16.mxu1 %v1240_v47 }
 0x44d   :  { %v1235_v7 = vsel %vm439_vm8, %v3677_v23, %v2010_v36  ;;  %v1236_v20 = vsel %vm439_vm8, %v2021_v14, %v2011_v11  ;;  %v896_v36 = vpack.c.bf16 %v880_v60, %v879_v19  ;;  %v3302_v23 = vld [vmem:[%s3642_s4] ss:$8 sps:$4 sm:$0xff]   ;;  %v2056_v11 = vunpack.i.h.bf16 %v3241_v4 }
 0x44e   :  { %v1239_v5 = vpack.c.bf16 %v1236_v20, %v1235_v7  ;;  %v2029_v47 = vpop.permute.xlu1 %2028  ;;  %v895_v19 = vpack.c.bf16 %v882_v58, %v881_v63  ;;  %v3318_v20 = vpop.permute.xlu0 %2083 }
 0x44f   :  { %v2031_v54 = vunpack.i.h.bf16 %v2029_v47  ;;  %v2030_v55 = vunpack.i.l.bf16 %v2029_v47 }
 0x450   :  { %1336 = vmatpush1.bf16.msra.mxu1 %v1239_v5 }
 0x451   :  { %v933_v18 = vsel %vm133_vm2, %v1915_v29, %v2030_v55  ;;  %v934_v28 = vsel %vm133_vm2, %v1916_v27, %v2031_v54  ;;  %1405 = vmatprep.subr.bf16.mxu1 %v896_v36  ;;  %v931_v15 = vsel %vm133_vm2, %v2030_v55, %v2035_v57  ;;  %v932_v13 = vsel %vm133_vm2, %v2031_v54, %v2036_v41 }
 0x452   :  { %v941_v4 = vpack.c.bf16 %v934_v28, %v933_v18  ;;  %v2039_v60 = vpop.permute.xlu1 %2038  ;;  %v942_v7 = vpack.c.bf16 %v932_v13, %v931_v15  ;;  %v2045_v27 = vunpack.i.l.bf16 %v3219_v16  ;;  %v975_v55 = vsel %vm182_vm3, %v2055_v25, %v1935_v2 }
 0x453   :  { %v2041_v5 = vunpack.i.h.bf16 %v2039_v60  ;;  %v2040_v29 = vunpack.i.l.bf16 %v2039_v60  ;;  %1352 = vmatmul.mubr.bf16.vlgmr.msra.gmra.mrb[4].mxu1 %v3302_v23  ;;  %v976_v54 = vsel %vm182_vm3, %v2056_v11, %v1936_v48  ;;  %v2065_v13 = vunpack.i.l.bf16 %v3259_v21 }
 0x454   :  { %1364 = vmatprep.subr.bf16.mxu0 %v942_v7  ;;  %1406 = vmatpush1.bf16.msra.mxu1 %v895_v19  ;;  %v3692_v7 = vunpack.i.l.bf16 %v3063_v6 }
 0x455   :  { %v930_v63 = vsel %vm133_vm2, %v2036_v41, %v2041_v5  ;;  %v929_v58 = vsel %vm133_vm2, %v2035_v57, %v2040_v29  ;;  %1365 = vmatpush1.bf16.msra.mxu0 %v941_v4  ;;  %v927_v16 = vsel %vm133_vm2, %v2040_v29, %v1920_v1  ;;  %v928_v32 = vsel %vm133_vm2, %v2041_v5, %v1921_v0  ;;  %v3353_v0 = vpop.permute.xlu0 %2093 }
 0x456   :  { %v943_v2 = vpack.c.bf16 %v930_v63, %v929_v58  ;;  %v2049_v47 = vpop.permute.xlu1 %2048  ;;  %v944_v48 = vpack.c.bf16 %v928_v32, %v927_v16  ;;  %1636 = vmatprep.mubr.msk.bf16.mxu1 %vm529_vm0, %v3025_v3  ;;  %v992_v57 = vpack.c.bf16 %v976_v54, %v975_v55  ;;  %v981_v1 = vsel %vm182_vm3, %v1930_v50, %v2045_v27 }
 0x457   :  { %v2051_v41 = vunpack.i.h.bf16 %v2049_v47  ;;  %v2050_v36 = vunpack.i.l.bf16 %v2049_v47  ;;  %v2075_v54 = vunpack.i.l.bf16 %v3283_v56  ;;  %v2086_v16 = vunpack.i.h.bf16 %v3318_v20 }
 0x458   :  { %1407 = vmatprep.subr.bf16.mxu1 %v944_v48  ;;  %v2085_v32 = vunpack.i.l.bf16 %v3318_v20  ;;  %v3693_v48 = vunpack.i.l.bf16 %v3145_v24 }
 0x459   :  { %v978_v18 = vsel %vm182_vm3, %v2051_v41, %v2056_v11  ;;  %v977_v3 = vsel %vm182_vm3, %v2050_v36, %v2055_v25  ;;  %1408 = vmatpush1.bf16.msra.mxu1 %v943_v2  ;;  %v979_v50 = vsel %vm182_vm3, %v2045_v27, %v2050_v36  ;;  %v980_v49 = vsel %vm182_vm3, %v2046_v12, %v2051_v41 }
 0x45a   :  { %v991_v28 = vpack.c.bf16 %v978_v18, %v977_v3  ;;  %v2059_v15 = vpop.permute.xlu1 %2058  ;;  %1409 = vmatprep.subr.bf16.mxu1 %v992_v57  ;;  %v989_v11 = vpack.c.bf16 %v982_v31, %v981_v1  ;;  %v990_v60 = vpack.c.bf16 %v980_v49, %v979_v50  ;;  %v2076_v12 = vunpack.i.h.bf16 %v3283_v56 }
 0x45b   :  { %v2061_v19 = vunpack.i.h.bf16 %v2059_v15  ;;  %v2060_v4 = vunpack.i.l.bf16 %v2059_v15  ;;  %v3694_v41 = vunpack.i.h.bf16 %v3145_v24  ;;  %v3695_v31 = vunpack.i.l.bf16 %v3161_v46 }
 0x45c   :  { %1366 = vmatprep.subr.bf16.mxu0 %v990_v60  ;;  %v3696_v3 = vunpack.i.h.bf16 %v3161_v46  ;;  %v3697_v24 = vpack.c.bf16 %v2960_v40, %v2942_v53  ;;  %v3698_v49 = vunpack.i.l.bf16 %v3079_v52 }
 0x45d   :  { %v1030_v25 = vsel %vm231_vm4, %v1946_v59, %v2061_v19  ;;  %v1029_v5 = vsel %vm231_vm4, %v3692_v7, %v2060_v4  ;;  %1410 = vmatpush1.bf16.msra.mxu1 %v991_v28  ;;  %v1027_v29 = vsel %vm231_vm4, %v2060_v4, %v2065_v13  ;;  %v1028_v21 = vsel %vm231_vm4, %v2061_v19, %v2066_v61  ;;  %v3379_v59 = vpop.permute.xlu0 %2103 }
 0x45e   :  { %v2069_v27 = vpop.permute.xlu1 %2068  ;;  %v1038_v55 = vpack.c.bf16 %v1028_v21, %v1027_v29  ;;  %v1037_v6 = vpack.c.bf16 %v1030_v25, %v1029_v5  ;;  %1367 = vmatpush1.bf16.msra.mxu0 %v989_v11  ;;  %v1087_v18 = vsel %vm292_vm5, %v3695_v31, %v2075_v54  ;;  %v1088_v28 = vsel %vm292_vm5, %v3696_v3, %v2076_v12 }
 0x45f   :  { %v2071_v63 = vunpack.i.h.bf16 %v2069_v27  ;;  %v2070_v58 = vunpack.i.l.bf16 %v2069_v27  ;;  %v1097_v40 = vpack.c.bf16 %v1088_v28, %v1087_v18  ;;  %v2096_v11 = vunpack.i.h.bf16 %v3353_v0 }
 0x460   :  { %1368 = vmatprep.subr.bf16.mxu0 %v1038_v55  ;;  %v3700_v25 = vpack.c.bf16 %v2966_v39, %v2957_v44  ;;  %v2095_v7 = vunpack.i.l.bf16 %v3353_v0  ;;  %v3701_v5 = vpack.c.bf16 %v2954_v62, %v2939_v51  ;;  %v3702_v44 = vunpack.i.h.bf16 %v3093_v8 }
 0x461   :  { %v1026_v2 = vsel %vm231_vm4, %v2066_v61, %v2071_v63  ;;  %v1025_v47 = vsel %vm231_vm4, %v2065_v13, %v2070_v58  ;;  %v1023_v56 = vsel %vm231_vm4, %v2070_v58, %v3693_v48  ;;  %v1024_v36 = vsel %vm231_vm4, %v2071_v63, %v3694_v41  ;;  %v2114_v19 = vpop.permute.xlu0 %2113 }
 0x462   :  { %v1039_v57 = vpack.c.bf16 %v1026_v2, %v1025_v47  ;;  %v2079_v1 = vpop.permute.xlu1 %2078  ;;  %v1040_v20 = vpack.c.bf16 %v1024_v36, %v1023_v56  ;;  %1369 = vmatpush1.bf16.msra.mxu0 %v1037_v6  ;;  %v1093_v61 = vsel %vm292_vm5, %v2085_v32, %v3698_v49  ;;  %v3699_v13 = vunpack.i.h.bf16 %v3079_v52 }
 0x463   :  { %v2081_v15 = vunpack.i.h.bf16 %v2079_v1  ;;  %v2080_v50 = vunpack.i.l.bf16 %v2079_v1  ;;  %1370 = vmatprep.subr.bf16.mxu0 %v3697_v24  ;;  %v2116_v55 = vunpack.i.h.bf16 %v2114_v19  ;;  %v3703_v51 = vunpack.i.l.bf16 %v3093_v8 }
 0x464   :  { %1411 = vmatprep.subr.bf16.mxu1 %v1040_v20  ;;  %v1094_v46 = vsel %vm292_vm5, %v2086_v16, %v3699_v13  ;;  %v3704_v0 = vpack.c.bf16 %v2963_v45, %v2945_v35  ;;  %v2106_v56 = vunpack.i.h.bf16 %v3379_v59  ;;  %v2105_v41 = vunpack.i.l.bf16 %v3379_v59 }
 0x465   :  { %1412 = vmatpush1.bf16.msra.mxu1 %v1039_v57  ;;  %v1085_v4 = vsel %vm292_vm5, %v2075_v54, %v2080_v50  ;;  %v1086_v53 = vsel %vm292_vm5, %v2076_v12, %v2081_v15  ;;  %v1100_v27 = vpack.c.bf16 %v1094_v46, %v1093_v61  ;;  %v2115_v12 = vunpack.i.l.bf16 %v2114_v19 }
 0x466   :  { %v2089_v60 = vpop.permute.xlu1 %2088  ;;  %1413 = vmatprep.subr.bf16.mxu1 %v3700_v25  ;;  %v1098_v52 = vpack.c.bf16 %v1086_v53, %v1085_v4  ;;  %1371 = vmatpush1.bf16.msra.mxu0 %v3701_v5  ;;  %v1084_v54 = vsel %vm292_vm5, %v2081_v15, %v2086_v16  ;;  %v1083_v6 = vsel %vm292_vm5, %v2080_v50, %v2085_v32  ;;  %v3705_v35 = vunpack.i.l.bf16 %v3131_v22 }
 0x467   :  { %v2091_v29 = vunpack.i.h.bf16 %v2089_v60  ;;  %v2090_v21 = vunpack.i.l.bf16 %v2089_v60  ;;  %v1099_v2 = vpack.c.bf16 %v1084_v54, %v1083_v6  ;;  %v3706_v36 = vunpack.i.h.bf16 %v3131_v22 }
 0x468   :  { %1372 = vmatprep.subr.bf16.mxu0 %v1098_v52  ;;  %v1189_v45 = vsel %vm390_vm7, %v2115_v12, %v3705_v35  ;;  %v3707_v59 = vunpack.i.l.bf16 %v3203_v10  ;;  %v3708_v18 = vunpack.i.h.bf16 %v3203_v10  ;;  %v3709_v49 = vunpack.i.l.bf16 %v3221_v30  ;;  %v2124_v10 = vpop.permute.xlu0 %2123 }
 0x469   :  { %v1136_v39 = vsel %vm341_vm6, %v3702_v44, %v2091_v29  ;;  %v1135_v62 = vsel %vm341_vm6, %v3703_v51, %v2090_v21  ;;  %1414 = vmatpush1.bf16.msra.mxu1 %v3704_v0  ;;  %v1133_v63 = vsel %vm341_vm6, %v2090_v21, %v2095_v7  ;;  %v1134_v58 = vsel %vm341_vm6, %v2091_v29, %v2096_v11 }
 0x46a   :  { %v2099_v16 = vpop.permute.xlu1 %2098  ;;  %1415 = vmatprep.subr.bf16.mxu1 %v1100_v27  ;;  %v1146_v32 = vpack.c.bf16 %v1134_v58, %v1133_v63  ;;  %v1145_v47 = vpack.c.bf16 %v1136_v39, %v1135_v62  ;;  %1373 = vmatpush1.bf16.msra.mxu0 %v1097_v40  ;;  %v1190_v57 = vsel %vm390_vm7, %v2116_v55, %v3706_v36  ;;  %v3710_v13 = vunpack.i.h.bf16 %v3221_v30 }
 0x46b   :  { %v2101_v8 = vunpack.i.h.bf16 %v2099_v16  ;;  %v2100_v48 = vunpack.i.l.bf16 %v2099_v16  ;;  %v1183_v61 = vsel %vm390_vm7, %v3709_v49, %v2105_v41  ;;  %v1196_v19 = vpack.c.bf16 %v1190_v57, %v1189_v45 }
 0x46c   :  { %1374 = vmatprep.subr.bf16.mxu0 %v1146_v32  ;;  %v1184_v46 = vsel %vm390_vm7, %v3710_v13, %v2106_v56  ;;  %v2126_v21 = vunpack.i.h.bf16 %v2124_v10  ;;  %v3711_v27 = vunpack.i.h.bf16 %v3159_v37  ;;  %v3713_v16 = vunpack.i.l.bf16 %v3271_v17 }
 0x46d   :  { %v1132_v1 = vsel %vm341_vm6, %v2096_v11, %v2101_v8  ;;  %v1131_v20 = vsel %vm341_vm6, %v2095_v7, %v2100_v48  ;;  %1416 = vmatpush1.bf16.msra.mxu1 %v1099_v2  ;;  %v1141_v31 = vsel %vm341_vm6, %v2100_v48, %v3707_v59  ;;  %v1142_v22 = vsel %vm341_vm6, %v2101_v8, %v3708_v18 }
 0x46e   :  { %v1147_v3 = vpack.c.bf16 %v1132_v1, %v1131_v20  ;;  %v2109_v28 = vpop.permute.xlu1 %2108  ;;  %v1148_v15 = vpack.c.bf16 %v1142_v22, %v1141_v31  ;;  %1375 = vmatpush1.bf16.msra.mxu0 %v1145_v47  ;;  %v1193_v52 = vpack.c.bf16 %v1184_v46, %v1183_v61  ;;  %v2125_v7 = vunpack.i.l.bf16 %v2124_v10 }
 0x46f   :  { %v2111_v50 = vunpack.i.h.bf16 %v2109_v28  ;;  %v2110_v24 = vunpack.i.l.bf16 %v2109_v28 }
 0x470   :  { %1417 = vmatprep.subr.bf16.mxu1 %v1148_v15 }
 0x471   :  { %v1180_v4 = vsel %vm390_vm7, %v2111_v50, %v2116_v55  ;;  %v1179_v53 = vsel %vm390_vm7, %v2110_v24, %v2115_v12  ;;  %1418 = vmatpush1.bf16.msra.mxu1 %v1147_v3  ;;  %v1181_v40 = vsel %vm390_vm7, %v2105_v41, %v2110_v24  ;;  %v1182_v11 = vsel %vm390_vm7, %v2106_v56, %v2111_v50 }
 0x472   :  { %v1195_v30 = vpack.c.bf16 %v1180_v4, %v1179_v53  ;;  %v2119_v60 = vpop.permute.xlu1 %2118  ;;  %1419 = vmatprep.subr.bf16.mxu1 %v1196_v19  ;;  %v1194_v25 = vpack.c.bf16 %v1182_v11, %v1181_v40  ;;  %v3712_v12 = vunpack.i.l.bf16 %v3159_v37 }
 0x473   :  { %v2121_v5 = vunpack.i.h.bf16 %v2119_v60  ;;  %v2120_v29 = vunpack.i.l.bf16 %v2119_v60 }
 0x474   :  { %1376 = vmatprep.subr.bf16.mxu0 %v1194_v25 }
 0x475   :  { %v1232_v55 = vsel %vm439_vm8, %v3711_v27, %v2121_v5  ;;  %v1231_v54 = vsel %vm439_vm8, %v3712_v12, %v2120_v29  ;;  %1377 = vmatpush1.bf16.msra.mxu0 %v1193_v52  ;;  %1420 = vmatpush1.bf16.msra.mxu1 %v1195_v30  ;;  %v1229_v6 = vsel %vm439_vm8, %v2120_v29, %v2125_v7 }
 0x476   :  { %v1241_v44 = vpack.c.bf16 %v1232_v55, %v1231_v54  ;;  %v2129_v39 = vpop.permute.xlu1 %2128  ;;  %v1230_v51 = vsel %vm439_vm8, %v2121_v5, %v2126_v21 }
 0x477   :  { %v2131_v62 = vunpack.i.h.bf16 %v2129_v39  ;;  %v2130_v0 = vunpack.i.l.bf16 %v2129_v39  ;;  %v1242_v63 = vpack.c.bf16 %v1230_v51, %v1229_v6 }
 0x479   :  { %v1228_v58 = vsel %vm439_vm8, %v2126_v21, %v2131_v62  ;;  %v1227_v37 = vsel %vm439_vm8, %v2125_v7, %v2130_v0  ;;  %1378 = vmatprep.subr.bf16.mxu0 %v1242_v63  ;;  %v1237_v32 = vsel %vm439_vm8, %v2130_v0, %v3713_v16  ;;  %v1238_v2 = vsel %vm439_vm8, %v2131_v62, %v2021_v14 }
 0x47a   :  { %v1243_v47 = vpack.c.bf16 %v1228_v58, %v1227_v37  ;;  %1379 = vmatpush1.bf16.msra.mxu0 %v1241_v44  ;;  %v1244_v8 = vpack.c.bf16 %v1238_v2, %v1237_v32 }
 0x47c   :  { %1421 = vmatprep.subr.bf16.mxu1 %v1244_v8 }
 0x47d   :  { %1395 = vmatmul.mubr.bf16.vlgmr.msra.gmra.mrb[8].mxu0 %v3302_v23  ;;  %1422 = vmatpush1.bf16.msra.mxu1 %v1243_v47 }
 0x480   :  { %1438 = vmatmul.mubr.bf16.vlgmr.msra.gmra.mrb[8].mxu1 %v3302_v23 }
 0x526   :  { %v3509_v48 = vpop.f32.mrb[4].mxu1 }
 0x527   :  { %v1452_v56 = vmul.f32 %v3509_v48, %v2806_v43  ;;  %v3513_v41 = vpop.f32.mrb[5].mxu1 }
 0x528   :  { %v1453_v26 = vmul.f32 %v3513_v41, %v2808_v34  ;;  %v3517_v17 = vpop.f32.mrb[6].mxu1 }
 0x529   :  { %v1458_v14 = vmul.f32 %v3517_v17, %v2806_v43  ;;  %v3521_v35 = vpop.f32.mrb[7].mxu1 }
 0x52a   :  { %v1464_v45 = vadd.f32 %v1453_v26, %v1452_v56  ;;  %v1459_v23 = vmul.f32 %v3521_v35, %v2808_v34 }
 0x52c   :  { %v1471_v36 = vadd.f32 %v1459_v23, %v1458_v14 }
 0x550   :  { %v3525_v57 = vpop.f32.mrb[8].mxu0 }
 0x551   :  { %v1454_v1 = vmul.f32 %v3525_v57, %v2826_v42  ;;  %v3529_v20 = vpop.f32.mrb[9].mxu0 }
 0x552   :  { %v1455_v59 = vmul.f32 %v3529_v20, %v2828_v9  ;;  %v3533_v31 = vpop.f32.mrb[10].mxu0 }
 0x553   :  { %v1465_v18 = vadd.f32 %v1464_v45, %v1454_v1  ;;  %v1460_v22 = vmul.f32 %v3533_v31, %v2826_v42  ;;  %v3537_v3 = vpop.f32.mrb[11].mxu0  ;;  %v3539_v28 = vpop.f32.mrb[8].mxu1 }
 0x554   :  { %v1461_v15 = vmul.f32 %v3537_v3, %v2828_v9  ;;  %v1456_v50 = vmul.f32 %v3539_v28, %v2830_v38  ;;  %v3545_v24 = vpop.f32.mrb[9].mxu1 }
 0x555   :  { %v1466_v49 = vadd.f32 %v1465_v18, %v1455_v59  ;;  %v1472_v61 = vadd.f32 %v1471_v36, %v1460_v22  ;;  %v1457_v13 = vmul.f32 %v3545_v24, %v2856_v33  ;;  %v3549_v46 = vpop.f32.mrb[10].mxu1 }
 0x556   :  { %v1462_v10 = vmul.f32 %v3549_v46, %v2830_v38  ;;  %v3553_v19 = vpop.f32.mrb[11].mxu1 }
 0x557   :  { %v1473_v4 = vadd.f32 %v1472_v61, %v1461_v15  ;;  %v1467_v53 = vadd.f32 %v1466_v49, %v1456_v50  ;;  %v1463_v40 = vmul.f32 %v3553_v19, %v2856_v33 }
 0x559   :  { %v1474_v11 = vadd.f32 %v1473_v4, %v1462_v10  ;;  %v1468_v30 = vadd.f32 %v1467_v53, %v1457_v13 }
 0x55b   :  { %v1475_v60 = vadd.f32 %v1474_v11, %v1463_v40  ;;  %1469 = vadd.xlane.f32.xlu0 %v1468_v30 }
 0x55d   :  { %1476 = vadd.xlane.f32.xlu1 %v1475_v60 }
 0x5e8   :  { %v1470_v25 = vpop.xlane.xlu0 %1469 }
 0x5e9   :  { %v3557_v52 = vmul.f32 0.001953125, %v1470_v25 }
 0x5ea   :  { %v1477_v7 = vpop.xlane.xlu1 %1476 }
 0x5eb   :  { %v3559_v5 = vmul.f32 0.001953125, %v1477_v7  ;;  %v1480_v29 = vsub.f32 %v3509_v48, %v3557_v52  ;;  %v1481_v21 = vsub.f32 %v3513_v41, %v3557_v52  ;;  %v1482_v27 = vsub.f32 %v3525_v57, %v3557_v52 }
 0x5ec   :  { %v1483_v55 = vsub.f32 %v3529_v20, %v3557_v52  ;;  %v1484_v12 = vsub.f32 %v3539_v28, %v3557_v52  ;;  %v1485_v51 = vsub.f32 %v3545_v24, %v3557_v52 }
 0x5ed   :  { %v1492_v54 = vmul.f32 %v1480_v29, %v2806_v43  ;;  %v1493_v6 = vmul.f32 %v1481_v21, %v2808_v34  ;;  %v1494_v44 = vmul.f32 %v1482_v27, %v2826_v42  ;;  %v1486_v39 = vsub.f32 %v3517_v17, %v3559_v5 }
 0x5ee   :  { %v1487_v62 = vsub.f32 %v3521_v35, %v3559_v5  ;;  %v1495_v0 = vmul.f32 %v1483_v55, %v2828_v9  ;;  %v1488_v37 = vsub.f32 %v3533_v31, %v3559_v5  ;;  %v1489_v16 = vsub.f32 %v3537_v3, %v3559_v5 }
 0x5ef   :  { %v1504_v63 = vmul.f32 %v1492_v54, %v1492_v54  ;;  %v1505_v58 = vmul.f32 %v1493_v6, %v1493_v6  ;;  %v1496_v32 = vmul.f32 %v1484_v12, %v2830_v38  ;;  %v1506_v2 = vmul.f32 %v1494_v44, %v1494_v44  ;;  %v1450_v54 = vld [vmem:[%s3644_s6] sm:$0xff]  ;;  %v1449_v44 = vld [vmem:[%s3643_s5 + $0x8] sm:$0xff] }
 0x5f0   :  { %v1498_v8 = vmul.f32 %v1486_v39, %v2806_v43  ;;  %v1490_v56 = vsub.f32 %v3549_v46, %v3559_v5  ;;  %v1499_v26 = vmul.f32 %v1487_v62, %v2808_v34  ;;  %v1500_v14 = vmul.f32 %v1488_v37, %v2826_v42 }
 0x5f1   :  { %v1516_v47 = vadd.f32 %v1505_v58, %v1504_v63  ;;  %v1497_v45 = vmul.f32 %v1485_v51, %v2856_v33  ;;  %v1507_v23 = vmul.f32 %v1495_v0, %v1495_v0  ;;  %v1491_v59 = vsub.f32 %v3553_v19, %v3559_v5  ;;  %v1451_v0 = vld [vmem:[%s3644_s6 + $0x8] sm:$0xff] }
 0x5f2   :  { %v1510_v1 = vmul.f32 %v1498_v8, %v1498_v8  ;;  %v1501_v18 = vmul.f32 %v1489_v16, %v2828_v9  ;;  %v1511_v22 = vmul.f32 %v1499_v26, %v1499_v26  ;;  %v1508_v15 = vmul.f32 %v1496_v32, %v1496_v32 }
 0x5f3   :  { %v1517_v36 = vadd.f32 %v1516_v47, %v1506_v2  ;;  %v1502_v50 = vmul.f32 %v1490_v56, %v2830_v38  ;;  %v1512_v49 = vmul.f32 %v1500_v14, %v1500_v14  ;;  %v1509_v34 = vmul.f32 %v1497_v45, %v1497_v45 }
 0x5f4   :  { %v1523_v61 = vadd.f32 %v1511_v22, %v1510_v1  ;;  %v1503_v42 = vmul.f32 %v1491_v59, %v2856_v33  ;;  %v1513_v10 = vmul.f32 %v1501_v18, %v1501_v18  ;;  %v1448_v33 = vld [vmem:[%s3643_s5] sm:$0xff]  ;;  %s2206_s5 = smov [#allocation7]  }
 0x5f5   :  { %v1518_v43 = vadd.f32 %v1517_v36, %v1507_v23  ;;  %v1514_v40 = vmul.f32 %v1502_v50, %v1502_v50  ;;  %s1615_s6 = sshll.u32 %s2206_s5, 4  ;;  %s1616_s6 = int_to_ptr.vmem [resolvable:$true] %s1615_s6 }
 0x5f6   :  { %v1524_v4 = vadd.f32 %v1523_v61, %v1512_v49  ;;  %v1515_v30 = vmul.f32 %v1503_v42, %v1503_v42  ;;  %s2168_s26 = scalar_lea.vmem %s1616_s6, 1536  ;;  %p2173_p9 = scmp.lt.s32.totalorder %s1616_s6, %s1616_s6 }
 0x5f7   :  { %v1519_v13 = vadd.f32 %v1518_v43, %v1508_v15  ;;  %p2169_p8 = scmp.ne.s32.totalorder %s1616_s6, %s2168_s26  ;;  %p2174_p10 = scmp.lt.s32.totalorder %s2168_s26, %s2168_s26 }
 0x5f8   :  { %v1525_v11 = vadd.f32 %v1524_v4, %v1513_v10 }
 0x5f9   :  { %v1520_v53 = vadd.f32 %v1519_v13, %v1509_v34  ;;  %p2175_p11 = por %p2174_p10, %p2173_p9 }
 0x5fa   :  { %v1526_v60 = vadd.f32 %v1525_v11, %v1514_v40 }
 0x5fb   :  { %1521 = vadd.xlane.f32.xlu0 %v1520_v53  ;;  %p2176_p12 = pnand %p2175_p11, %p2169_p8 }
 0x5fc   :  { %v1527_v9 = vadd.f32 %v1526_v60, %v1515_v30 }
 0x5ff   :  { %1528 = vadd.xlane.f32.xlu0 %v1527_v9 }
 0x688   :  { %v1522_v25 = vpop.xlane.xlu0 %1521 }
 0x689   :  { %v1530_v7 = vmul.f32 0.001953125, %v1522_v25 }
 0x68b   :  { %v1532_v29 = vadd.f32 1e-05, %v1530_v7 }
 0x68c   :  { %v1529_v38 = vpop.xlane.xlu0 %1528 }
 0x68d   :  { %2142 = vrsqrt.f32 %v1532_v29  ;;  %v1531_v21 = vmul.f32 0.001953125, %v1529_v38 }
 0x68f   :  { %v1533_v27 = vadd.f32 1e-05, %v1531_v21 }
 0x691   :  { %2144 = vrsqrt.f32 %v1533_v27 }
 0x697   :  { %v2143_v55 = vpop.eup %2142 }
 0x698   :  { %v1536_v12 = vmul.f32 %v2143_v55, %v1448_v33 }
 0x69a   :  { %1544 = vperm.xlu1 %1890, %v1536_v12   ;;  %v1538_v6 = vmul.f32 %v1536_v12, %v3557_v52 }
 0x69b   :  { %v2145_v39 = vpop.eup %2144 }
 0x69c   :  { %v1540_v51 = vsub.f32 %v1450_v54, %v1538_v6  ;;  %v1537_v62 = vmul.f32 %v2145_v39, %v1449_v44 }
 0x69e   :  { %1566 = vperm.xlu1 %1890, %v1540_v51   ;;  %1549 = vperm.xlu0 %1891, %v1537_v62   ;;  %v1539_v63 = vmul.f32 %v1537_v62, %v3559_v5 }
 0x6a0   :  { %v1541_v58 = vsub.f32 %v1451_v0, %v1539_v63 }
 0x6a2   :  { %1571 = vperm.xlu1 %1890, %v1541_v58  }
 0x719   :  { %v1545_v37 = vpop.permute.xlu1 %1544 }
 0x71a   :  { %v1552_v52 = vmul.f32 %v1545_v37, %v3509_v48  ;;  %v1553_v16 = vmul.f32 %v1545_v37, %v3513_v41  ;;  %v1554_v32 = vmul.f32 %v1545_v37, %v3525_v57  ;;  %v1555_v2 = vmul.f32 %v1545_v37, %v3529_v20 }
 0x71b   :  { %v1556_v47 = vmul.f32 %v1545_v37, %v3539_v28  ;;  %v1557_v8 = vmul.f32 %v1545_v37, %v3545_v24 }
 0x71d   :  { %v1567_v56 = vpop.permute.xlu1 %1566  ;;  %v1550_v26 = vpop.permute.xlu0 %1549 }
 0x71e   :  { %v1574_v14 = vadd.f32 %v1567_v56, %v1552_v52  ;;  %v1575_v45 = vadd.f32 %v1567_v56, %v1553_v16  ;;  %v1576_v5 = vadd.f32 %v1567_v56, %v1554_v32  ;;  %v1577_v23 = vadd.f32 %v1567_v56, %v1555_v2 }
 0x71f   :  { %v1558_v36 = vmul.f32 %v1550_v26, %v3517_v17  ;;  %v1559_v48 = vmul.f32 %v1550_v26, %v3521_v35  ;;  %v1560_v41 = vmul.f32 %v1550_v26, %v3533_v31  ;;  %v1561_v57 = vmul.f32 %v1550_v26, %v3537_v3 }
 0x720   :  { %v1578_v1 = vadd.f32 %v1567_v56, %v1556_v47  ;;  %v1579_v20 = vadd.f32 %v1567_v56, %v1557_v8  ;;  %v1586_v59 = vmax.f32 %v1574_v14, 0.0  ;;  %v1587_v28 = vmax.f32 %v1575_v45, 0.0 }
 0x721   :  { %v1588_v18 = vmax.f32 %v1576_v5, 0.0  ;;  %v1589_v24 = vmax.f32 %v1577_v23, 0.0  ;;  %v1562_v22 = vmul.f32 %v1550_v26, %v3549_v46  ;;  %v1563_v15 = vmul.f32 %v1550_v26, %v3553_v19  ;;  %v1572_v49 = vpop.permute.xlu1 %1571 }
 0x722   :  { %v1590_v43 = vmax.f32 %v1578_v1, 0.0  ;;  %v1591_v50 = vmax.f32 %v1579_v20, 0.0  ;;  %1598 = vst [vmem:[#allocation7] sm:$0xff] %v1586_v59  ;;  %1599 = vst [vmem:[#allocation7 + $0x8] sm:$0xff] %v1587_v28  ;;  %v1580_v17 = vadd.f32 %v1572_v49, %v1558_v36  ;;  %v1581_v35 = vadd.f32 %v1572_v49, %v1559_v48 }
 0x723   :  { %1600 = vst [vmem:[#allocation7 + $0x10] sm:$0xff] %v1588_v18  ;;  %1601 = vst [vmem:[#allocation7 + $0x18] sm:$0xff] %v1589_v24  ;;  %v1582_v31 = vadd.f32 %v1572_v49, %v1560_v41  ;;  %v1583_v3 = vadd.f32 %v1572_v49, %v1561_v57  ;;  %v1584_v61 = vadd.f32 %v1572_v49, %v1562_v22 }
 0x724   :  { %1602 = vst [vmem:[#allocation7 + $0x20] sm:$0xff] %v1590_v43  ;;  %1603 = vst [vmem:[#allocation7 + $0x28] sm:$0xff] %v1591_v50  ;;  %v1585_v34 = vadd.f32 %v1572_v49, %v1563_v15  ;;  %v1592_v46 = vmax.f32 %v1580_v17, 0.0  ;;  %v1593_v13 = vmax.f32 %v1581_v35, 0.0 }
 0x725   :  { %v1594_v19 = vmax.f32 %v1582_v31, 0.0  ;;  %v1595_v42 = vmax.f32 %v1583_v3, 0.0  ;;  %v1596_v10 = vmax.f32 %v1584_v61, 0.0 }
 0x726   :  { %v1597_v4 = vmax.f32 %v1585_v34, 0.0  ;;  %1604 = vst [vmem:[#allocation7 + $0x30] sm:$0xff] %v1592_v46  ;;  %1605 = vst [vmem:[#allocation7 + $0x38] sm:$0xff] %v1593_v13 }
 0x727   :  { %1606 = vst [vmem:[#allocation7 + $0x40] sm:$0xff] %v1594_v19  ;;  %1607 = vst [vmem:[#allocation7 + $0x48] sm:$0xff] %v1595_v42 }
 0x728   :  { %1608 = vst [vmem:[#allocation7 + $0x50] sm:$0xff] %v1596_v10  ;;  %1609 = vst [vmem:[#allocation7 + $0x58] sm:$0xff] %v1597_v4 }
 0x729   :  { %2179 = shalt.err (!%p2176_p12)
}
 0x72a   :  { %s2180_s29 = scalar_lea.hbm %s3646_s8, 1536 }
 0x72b   :  { %p2181_p13 = scmp.ne.s32.totalorder %s3646_s8, %s2180_s29  ;;  %p2184_p0 = scmp.lt.u32.totalorder %s2180_s29, %s3646_s8 }
 0x72d   :  { %p2186_p1 = pnand %p2184_p0, %p2181_p13 }
 0x72f   :  { %2189 = shalt.err (!%p2186_p1)
}
 0x730   :  { %1621 = dma.vmem_to_hbm [thread:$0]  %s1616_s6, 1536, %s3646_s8, [#allocation6], %s2195_s15, %s2195_s15, %s2196_s16  }
 0x731   :  { %2192 = dma.done.wait [#allocation6], 1536  }
 0x732   :  { %2193 = vsyncadd [#allocation6], 4294965760 }
 0x733   :  { %1625 = vsyncpa [#allocation5], 1 }
 0x734   :  { %1626 = vsyncpa [#allocation6], 1 }

</bundles_post_ra>
